<compile_context>
chip_gen: v7x
topology: tpu7x:2x2x1
jax: 0.10.0
libtpu: 0.0.40
codegen_flags: <defaults>
</compile_context>

<pallas_src>
import functools
from math import sqrt

import jax
import jax.numpy as jnp
from jax.experimental import pallas as pl
from jax.experimental.pallas import tpu as pltpu


def _round_up(x, m):
    return ((x + m - 1) // m) * m


def _auto_tile_h(h_out, wp, w_out, cp, op, kh, kw, itemsize, budget_bytes=8 * 2**20):
    """Largest row tile (divisor of h_out, preferring multiples of 8) whose
    double-buffered activation blocks + temporaries stay under a conservative,
    generation-safe VMEM budget."""
    divisors = [d for d in range(1, h_out + 1) if h_out % d == 0]
    cands = [d for d in divisors if d % 8 == 0] or divisors
    best = cands[0]
    for th in cands:
        thp = th + kh - 1
        need = (2 * thp * wp * cp * itemsize          # double-buffered input block
                + 2 * th * w_out * op * itemsize      # double-buffered output block
                + th * w_out * op * 4                 # f32 accumulator temp
                + thp * w_out * kw * cp * itemsize)   # in-kernel width-im2col slab
        if need <= budget_bytes:
            best = th
    return best


def _wsconv2d_kernel(x_ref, w_ref, b_ref, o_ref, *, tile_h, w_out, kh, kw, cp):
    """One (batch, row-tile) grid step.

    x_ref: (1, TH+KH-1, W_out+KW-1, Cp)  padded NHWC input window (native dtype)
    w_ref: (KH, KW*Cp, Op)               scale-folded, channel-padded weights
    b_ref: (1, Op)                       bias (f32)
    o_ref: (1, TH*W_out, Op)             flattened, lane-dense output rows
    """
    xs = x_ref[0]                                          # (THp, Wp, Cp)
    thp = tile_h + kh - 1

    # Fold the KW width taps into the contraction dim (in-VMEM width im2col),
    # then flatten rows once: xw2[(r*W_out + w), j*Cp + c] == xs[r, w + j, c]
    cols = [xs[:, j:j + w_out, :] for j in range(kw)]
    xw = cols[0] if kw == 1 else jnp.concatenate(cols, axis=-1)   # (THp, W_out, KW*Cp)
    xw2 = xw.reshape(thp * w_out, kw * cp)

    # KH shift-and-matmul steps; the row shift is a static slice along the
    # flattened (major) row axis.  Accumulate in f32 values.
    acc = None
    for i in range(kh):
        patch = xw2[i * w_out:(i + tile_h) * w_out]
        part = jnp.dot(patch, w_ref[i], preferred_element_type=jnp.float32)
        acc = part if acc is None else acc + part

    # Bias folded into the store epilogue (single f32 broadcast add).
    o_ref[0] = (acc + b_ref[...]).astype(o_ref.dtype)


def wsconv2d(x_nchw, weight_oihw, bias_o, *, stride=1, padding=1, gain=2, tile_h=None):
    """WSConv2d forward.  x_nchw: (N, C_in, H, W) -> (N, C_out, H_out, W_out)."""
    assert stride == 1, "only stride=1 (the ProGAN default) is implemented"
    # TODO(synk): stride > 1 would need a strided output index map; unused by ProGAN.
    N, C, H, W = x_nchw.shape
    O, Ci, KH, KW = weight_oihw.shape
    assert Ci == C
    scale = sqrt(gain / (C * KH * KW))

    H_out = H + 2 * padding - KH + 1
    W_out = W + 2 * padding - KW + 1
    Wp = W_out + KW - 1                      # padded width seen by the kernel
    Cp = _round_up(C, 128)                   # lane-dense contraction channels
    Op = _round_up(O, 128)                   # lane-dense output channels
    itemsize = jnp.dtype(x_nchw.dtype).itemsize

    if tile_h is None:
        tile_h = _auto_tile_h(H_out, Wp, W_out, Cp, Op, KH, KW, itemsize)
    assert H_out % tile_h == 0, "tile_h must divide H_out"
    n_ht = H_out // tile_h
    assert n_ht == 1 or (tile_h * W_out) % 8 == 0, \
        "row-tiled output blocks must be sublane-aligned (tile_h*W_out % 8 == 0)"
    THp = tile_h + KH - 1

    # ---- glue (plain JAX, layout plumbing only) ----
    x_nhwc = jnp.transpose(x_nchw, (0, 2, 3, 1))
    x_sp = jnp.pad(
        x_nhwc,
        ((0, 0), (padding, padding), (padding, padding), (0, Cp - C)),
    )                                                        # (N, H_out+KH-1, Wp, Cp)
    # Overlapping row windows so every Pallas block is a plain Blocked tile.
    if n_ht == 1:
        x_tiles = x_sp
    else:
        x_tiles = jnp.stack(
            [x_sp[:, t * tile_h: t * tile_h + THp] for t in range(n_ht)], axis=1
        ).reshape(N * n_ht, THp, Wp, Cp)

    # (O, C, KH, KW) -> (KH, KW*Cp, Op), scale folded in, channels zero-padded.
    w_t = jnp.transpose(weight_oihw, (2, 3, 1, 0)) * scale          # (KH, KW, C, O)
    w_t = jnp.pad(w_t, ((0, 0), (0, 0), (0, Cp - C), (0, Op - O)))
    w_fold = w_t.reshape(KH, KW * Cp, Op).astype(x_nchw.dtype)
    b2d = jnp.pad(bias_o.astype(jnp.float32), (0, Op - O)).reshape(1, Op)

    # ---- VMEM budget: raise the scoped limit with headroom, cap below v7x physical ----
    est = (2 * THp * Wp * Cp * itemsize
           + 2 * tile_h * W_out * Op * itemsize
           + 2 * KH * KW * Cp * Op * itemsize
           + tile_h * W_out * Op * 4
           + THp * W_out * KW * Cp * itemsize)
    vmem_limit = int(min(max(32 * 2**20, 2 * est), 56 * 2**20))

    kernel = functools.partial(
        _wsconv2d_kernel, tile_h=tile_h, w_out=W_out, kh=KH, kw=KW, cp=Cp
    )

    cost = pl.CostEstimate(
        flops=2 * N * H_out * W_out * O * C * KH * KW,
        transcendentals=0,
        bytes_accessed=(x_tiles.size * itemsize
                        + w_fold.size * itemsize
                        + N * H_out * W_out * Op * itemsize),
    )

    out2d = pl.pallas_call(
        kernel,
        out_shape=jax.ShapeDtypeStruct((N, H_out * W_out, Op), x_nchw.dtype),
        grid_spec=pltpu.PrefetchScalarGridSpec(
            num_scalar_prefetch=0,
            grid=(N, n_ht),
            in_specs=[
                pl.BlockSpec((1, THp, Wp, Cp),
                             lambda n, t, _m=n_ht: (n * _m + t, 0, 0, 0)),
                # Grid-invariant blocks: fetched once, kept resident across steps.
                pl.BlockSpec((KH, KW * Cp, Op), lambda n, t: (0, 0, 0)),
                pl.BlockSpec((1, Op), lambda n, t: (0, 0)),
            ],
            out_specs=pl.BlockSpec((1, tile_h * W_out, Op), lambda n, t: (n, t, 0)),
        ),
        compiler_params=pltpu.CompilerParams(
            dimension_semantics=("parallel", "parallel"),
            vmem_limit_bytes=vmem_limit,
        ),
        cost_estimate=cost,
    )(x_tiles, w_fold, b2d)

    out = out2d.reshape(N, H_out, W_out, Op)[..., :O]
    return jnp.transpose(out, (0, 3, 1, 2))                 # back to NCHW


def _reference(x_nchw, weight_oihw, bias_o, gain=2, padding=1):
    """Pure-JAX reference mirroring the PyTorch forward."""
    C, KH, KW = weight_oihw.shape[1], weight_oihw.shape[2], weight_oihw.shape[3]
    scale = sqrt(gain / (C * KH * KW))
    y = jax.lax.conv_general_dilated(
        x_nchw * scale, weight_oihw,
        window_strides=(1, 1), padding=((padding, padding), (padding, padding)),
        dimension_numbers=("NCHW", "OIHW", "NCHW"),
    )
    return y + bias_o.reshape(1, -1, 1, 1)


if __name__ == "__main__":
    key = jax.random.PRNGKey(0)
    kx, kwt, kb = jax.random.split(key, 3)

    N, C_in, H, W = 2, 4, 16, 16
    C_out, K = 8, 3

    x = jax.random.normal(kx, (N, C_in, H, W), dtype=jnp.float32)
    weight = jax.random.normal(kwt, (C_out, C_in, K, K), dtype=jnp.float32)  # nn.init.normal_
    bias = 0.1 * jax.random.normal(kb, (C_out,), dtype=jnp.float32)          # exercise the bias path

    ref = _reference(x, weight, bias, gain=2, padding=1)

    # Exercise both the multi-row-tile path (grid=(N,2)) and the auto/whole-image path.
    for th in (8, None):
        out = wsconv2d(x, weight, bias, stride=1, padding=1, gain=2, tile_h=th)
        out = jax.block_until_ready(out)
        assert out.shape == (N, C_out, H, W)
        assert jnp.allclose(out, ref, atol=1e-4, rtol=1e-4), f"mismatch for tile_h={th}"

    print("KERNEL_OK")
</pallas_src>

<mosaic_0001>
module attributes {stable_mosaic.version = 11 : i64} {
  func.func @_wsconv2d_kernel(%arg0: i32, %arg1: i32, %arg2: memref<1x10x18x128xf32, #tpu.memory_space<vmem>>, %arg3: memref<3x384x128xf32, #tpu.memory_space<vmem>>, %arg4: memref<1x128xf32, #tpu.memory_space<vmem>>, %arg5: memref<1x128x128xf32, #tpu.memory_space<vmem>>) attributes {dimension_semantics = [#tpu.dimension_semantics<parallel>, #tpu.dimension_semantics<parallel>], iteration_bounds = array<i64: 2, 2>, scalar_prefetch = 0 : i64, scratch_operands = 0 : i64, tpu.core_type = #tpu.core_type<tc>, window_params = [{transform_indices = @transform_0, window_bounds = array<i64: 1, 10, 18, 128>}, {pipeline_mode = #tpu.pipeline_mode<synchronous>, transform_indices = @transform_1, window_bounds = array<i64: 3, 384, 128>}, {pipeline_mode = #tpu.pipeline_mode<synchronous>, transform_indices = @transform_2, window_bounds = array<i64: 1, 128>}, {transform_indices = @transform_3, window_bounds = array<i64: 1, 128, 128>}]} {
    %c0 = arith.constant 0 : index
    %c0_0 = arith.constant 0 : index
    %c0_1 = arith.constant 0 : index
    %c0_2 = arith.constant 0 : index
    %0 = vector.load %arg2[%c0, %c0_0, %c0_1, %c0_2] : memref<1x10x18x128xf32, #tpu.memory_space<vmem>>, vector<1x10x18x128xf32>
    %1 = vector.shape_cast %0 : vector<1x10x18x128xf32> to vector<10x18x128xf32>
    %2 = vector.extract_strided_slice %1 {offsets = [0, 0, 0], sizes = [10, 16, 128], strides = [1, 1, 1]} : vector<10x18x128xf32> to vector<10x16x128xf32>
    %3 = vector.extract_strided_slice %1 {offsets = [0, 1, 0], sizes = [10, 16, 128], strides = [1, 1, 1]} : vector<10x18x128xf32> to vector<10x16x128xf32>
    %4 = vector.extract_strided_slice %1 {offsets = [0, 2, 0], sizes = [10, 16, 128], strides = [1, 1, 1]} : vector<10x18x128xf32> to vector<10x16x128xf32>
    %5 = tpu.concatenate %2, %3, %4 in 2 : vector<10x16x128xf32>, vector<10x16x128xf32>, vector<10x16x128xf32> -> vector<10x16x384xf32>
    %6 = vector.shape_cast %5 : vector<10x16x384xf32> to vector<160x384xf32>
    %7 = vector.extract_strided_slice %6 {offsets = [0, 0], sizes = [128, 384], strides = [1, 1]} : vector<160x384xf32> to vector<128x384xf32>
    %c0_3 = arith.constant 0 : index
    %c0_4 = arith.constant 0 : index
    %c0_5 = arith.constant 0 : index
    %8 = vector.load %arg3[%c0_3, %c0_4, %c0_5] : memref<3x384x128xf32, #tpu.memory_space<vmem>>, vector<1x384x128xf32>
    %9 = vector.shape_cast %8 : vector<1x384x128xf32> to vector<384x128xf32>
    %cst = arith.constant dense<0.000000e+00> : vector<128x128xf32>
    %10 = tpu.matmul %7, %9, %cst {dimension_numbers = #tpu.dot_dimension_numbers<[1], [0], [0], [1], [0, 0, 1, 1], [], []>} : vector<128x384xf32>, vector<384x128xf32>, vector<128x128xf32> -> vector<128x128xf32>
    %11 = vector.extract_strided_slice %6 {offsets = [16, 0], sizes = [128, 384], strides = [1, 1]} : vector<160x384xf32> to vector<128x384xf32>
    %c1 = arith.constant 1 : index
    %c0_6 = arith.constant 0 : index
    %c0_7 = arith.constant 0 : index
    %12 = vector.load %arg3[%c1, %c0_6, %c0_7] : memref<3x384x128xf32, #tpu.memory_space<vmem>>, vector<1x384x128xf32>
    %13 = vector.shape_cast %12 : vector<1x384x128xf32> to vector<384x128xf32>
    %cst_8 = arith.constant dense<0.000000e+00> : vector<128x128xf32>
    %14 = tpu.matmul %11, %13, %cst_8 {dimension_numbers = #tpu.dot_dimension_numbers<[1], [0], [0], [1], [0, 0, 1, 1], [], []>} : vector<128x384xf32>, vector<384x128xf32>, vector<128x128xf32> -> vector<128x128xf32>
    %15 = arith.addf %10, %14 : vector<128x128xf32>
    %16 = vector.extract_strided_slice %6 {offsets = [32, 0], sizes = [128, 384], strides = [1, 1]} : vector<160x384xf32> to vector<128x384xf32>
    %c2 = arith.constant 2 : index
    %c0_9 = arith.constant 0 : index
    %c0_10 = arith.constant 0 : index
    %17 = vector.load %arg3[%c2, %c0_9, %c0_10] : memref<3x384x128xf32, #tpu.memory_space<vmem>>, vector<1x384x128xf32>
    %18 = vector.shape_cast %17 : vector<1x384x128xf32> to vector<384x128xf32>
    %cst_11 = arith.constant dense<0.000000e+00> : vector<128x128xf32>
    %19 = tpu.matmul %16, %18, %cst_11 {dimension_numbers = #tpu.dot_dimension_numbers<[1], [0], [0], [1], [0, 0, 1, 1], [], []>} : vector<128x384xf32>, vector<384x128xf32>, vector<128x128xf32> -> vector<128x128xf32>
    %20 = arith.addf %15, %19 : vector<128x128xf32>
    %c0_12 = arith.constant 0 : index
    %c0_13 = arith.constant 0 : index
    %21 = vector.load %arg4[%c0_12, %c0_13] : memref<1x128xf32, #tpu.memory_space<vmem>>, vector<1x128xf32>
    %22 = vector.broadcast %21 : vector<1x128xf32> to vector<128x128xf32>
    %23 = arith.addf %20, %22 : vector<128x128xf32>
    %c0_14 = arith.constant 0 : index
    %c0_15 = arith.constant 0 : index
    %c0_16 = arith.constant 0 : index
    %24 = vector.load %arg5[%c0_14, %c0_15, %c0_16] : memref<1x128x128xf32, #tpu.memory_space<vmem>>, vector<1x128x128xf32>
    %25 = vector.shape_cast %24 : vector<1x128x128xf32> to vector<128x128xf32>
    %26 = vector.shape_cast %23 : vector<128x128xf32> to vector<1x128x128xf32>
    tpu.vector_store %arg5[%c0_14, %c0_15, %c0_16], %26 {strides = array<i32>} : memref<1x128x128xf32, #tpu.memory_space<vmem>>, vector<1x128x128xf32>,
    return
  }
  func.func @transform_0(%arg0: i32, %arg1: i32) -> (i32, i32, i32, i32) {
    %c2_i32 = arith.constant 2 : i32
    %0 = arith.muli %arg0, %c2_i32 : i32
    %1 = arith.addi %0, %arg1 : i32
    %c0_i32 = arith.constant 0 : i32
    %c0_i32_0 = arith.constant 0 : i32
    %c0_i32_1 = arith.constant 0 : i32
    %c0_i32_2 = arith.constant 0 : i32
    return %1, %c0_i32, %c0_i32_0, %c0_i32_1 : i32, i32, i32, i32
  }
  func.func @transform_1(%arg0: i32, %arg1: i32) -> (i32, i32, i32) {
    %c0_i32 = arith.constant 0 : i32
    %c0_i32_0 = arith.constant 0 : i32
    %c0_i32_1 = arith.constant 0 : i32
    %c0_i32_2 = arith.constant 0 : i32
    return %c0_i32, %c0_i32_0, %c0_i32_1 : i32, i32, i32
  }
  func.func @transform_2(%arg0: i32, %arg1: i32) -> (i32, i32) {
    %c0_i32 = arith.constant 0 : i32
    %c0_i32_0 = arith.constant 0 : i32
    %c0_i32_1 = arith.constant 0 : i32
    return %c0_i32, %c0_i32_0 : i32, i32
  }
  func.func @transform_3(%arg0: i32, %arg1: i32) -> (i32, i32, i32) {
    %c0_i32 = arith.constant 0 : i32
    %c0_i32_0 = arith.constant 0 : i32
    return %arg0, %arg1, %c0_i32 : i32, i32, i32
  }
}

</mosaic_0001>

<bundles_post_ra>
// kernel: tpu_custom_call.1
= control target key start
LH: loop header
LB: loop body
LE: loop exit
PB: predicated region body
PF: predicated region fallthrough
CT: control target
= control target key end

     0   :  { %8 = vsyncpa [#allocation3], 0  ;;  %s3820_s0 = inlined_call_operand.vmem [shape: f32[4,10,18,128], index: 0, kind: input, shape index: {}]   ;;  %s3821_s1 = inlined_call_operand.vmem [shape: f32[3,384,128], index: 1, kind: input, shape index: {}]   ;;  %s3822_s2 = inlined_call_operand.vmem [shape: f32[1,128], index: 2, kind: input, shape index: {}]   ;;  %s3823_s3 = inlined_call_operand.hbm [shape: f32[2,256,128], index: 3, kind: output, shape index: {}]  }
   0x1   :  { %10 = vsyncpa [#allocation3 + $0x1], 0  ;;  %s2661_s12 = smov 0   ;;  %s2663_s13 = smov 0  }
   0x2   :  { %s2665_s14 = smov 0   ;;  %s2667_s15 = smov 0  }
   0x3   :  { %s2669_s16 = smov 0   ;;  %s2671_s17 = smov 0  }
   0x4   :  { %s2673_s18 = smov 0   ;;  %s2675_s19 = smov 0  }
   0x5 LB: > { %s1563_s20 = sadd.s32 4294967295, %s2636_s19   ;;  %s1564_s21 = sadd.s32 4294967294, %s2636_s19   ;;  %s2636_s19 = sphi %s2675_s19, %s16_s19   ;;  %s2632_s18 = sphi %s2673_s18, %s3893_s18   ;;  %s2628_s17 = sphi %s2671_s17, %s3892_s17   ;;  %s2624_s16 = sphi %s2669_s16, %s3891_s16   ;;  %s2620_s15 = sphi %s2667_s15, %s3890_s15   ;;  %s2616_s14 = sphi %s2665_s14, %s3889_s14   ;;  %s2612_s13 = sphi %s2663_s13, %s3888_s13   ;;  %s2608_s12 = sphi %s2661_s12, %s3887_s12  }
   0x6   : > { %s25_s22 = sadd.s32 1, %s2628_s17  ;;  %s28_s23 = sadd.s32 1, %s2632_s18 }
   0x7   : > { %p26_p0 = scmp.ge.s32.totalorder %s25_s22, 2  ;;  %p119_p1 = scmp.ne.s32.totalorder %s2616_s14, %s2612_s13 }
   0x8   : > { %p120_p2 = scmp.eq.s32.totalorder %s1563_s20, 3  ;;  %p125_p5 = scmp.ne.s32.totalorder %s2612_s13, %s2608_s12 }
   0x9   : > { %s3895_s22 = smov (%p26_p0, %s25_s22), 0  ;;  %s3897_s23 = smov (!%p26_p0, %s28_s23), %s2632_s18 }
   0xa   : > { %s105_s24 = ssub.s32 %s2628_s17, %s3895_s22  ;;  %p2712_p3 = por %p120_p2, %p119_p1 }
   0xb   : > { %p30_p4 = scmp.ge.s32.totalorder %s3897_s23, 2  ;;  %p126_p6 = scmp.eq.s32.totalorder %s1564_s21, 3 }
   0xc   : > { %p1569_p7 = scmp.ge.s32.totalorder %s2636_s19, 1  ;;  %p162_p9 = scmp.lt.s32.totalorder %s2636_s19, 5 }
   0xd   : > { %s3899_s23 = smov (%p30_p4, %s3897_s23), 0  ;;  %p2721_p8 = por %p126_p6, %p125_p5 }
   0xe   : > { %s104_s27 = ssub.s32 %s2632_s18, %s3899_s23  ;;  %s109_s28 = sadd.s32 1, %s2616_s14 }
   0xf   : > { %s106_s29 = sor.u32 %s105_s24, %s104_s27  ;;  %p163_p10 = pnand %p1569_p7, %p162_p9 }
  0x10   : > { %p107_p11 = scmp.eq.s32.totalorder %s106_s29, 0 }
  0x11   : > { %166 = sbr.rel (%p163_p10) target bundleno = 433 (0x1b1), region = 32 }
  0x12   : > { %s2730_s30 = scalar_select %p107_p11, %s2616_s14, %s109_s28  }
  0x18   : > { %v1589_v0 = vld [vmem:[%s3821_s1 + $0x200] sm:$0xff]  ;;  %v1590_v1 = vld [vmem:[%s3821_s1 + $0x208] sm:$0xff]  ;;  %s1571_s10 = sshll.u32 %s2624_s16, 1  ;;  %v1591_v9 = vld [vmem:[%s3821_s1 + $0x210] sm:$0xff]  ;;  %vm258_vm0 = vcmask 1046528   ;;  %vm329_vm1 = vcmask 1045504  }
  0x19   : > { %v1605_v2 = vld [vmem:[%s3821_s1 + $0x280] sm:$0xff]  ;;  %v2180_v3 = vpack.c.bf16 %v1590_v1, %v1589_v0  ;;  %v1606_v4 = vld [vmem:[%s3821_s1 + $0x288] sm:$0xff]  ;;  %s189_s29 = sadd.s32 %s2620_s15, %s1571_s10  ;;  %v1592_v10 = vld [vmem:[%s3821_s1 + $0x218] sm:$0xff]  ;;  %s185_s5 = sand.u32 1, %s2612_s13  }
  0x1a   : > { %v1573_v5 = vld [vmem:[%s3821_s1 + $0x180] sm:$0xff]  ;;  %v1574_v6 = vld [vmem:[%s3821_s1 + $0x188] sm:$0xff]  ;;  %v2212_v7 = vpack.c.bf16 %v1606_v4, %v1605_v2  ;;  %v1607_v11 = vld [vmem:[%s3821_s1 + $0x290] sm:$0xff]  ;;  %p190_p12 = scmp.lt.s32.totalorder %s189_s29, 3  ;;  %v2184_v12 = vpack.c.bf16 %v1592_v10, %v1591_v9  ;;  %s1570_s6 = sshll.u32 %s185_s5, 7 }
  0x1b   : > { %v2182_v8 = vpack.c.bf16 %v1574_v6, %v1573_v5  ;;  %2181 = vmatprep.subr.bf16.mxu0 %v2180_v3  ;;  %v1608_v13 = vld [vmem:[%s3821_s1 + $0x298] sm:$0xff]  ;;  %v1575_v14 = vld [vmem:[%s3821_s1 + $0x190] sm:$0xff]  ;;  %v1593_v18 = vld [vmem:[%s3821_s1 + $0x220] sm:$0xff]  ;;  %s1671_s11 = sshll.u32 %s2620_s15, 4  ;;  %s3768_s27 = scalar_lea.sflag [#allocation3], %s185_s5 }
  0x1c   : > { %v1576_v15 = vld [vmem:[%s3821_s1 + $0x198] sm:$0xff]  ;;  %2213 = vmatprep.subr.bf16.mxu1 %v2212_v7  ;;  %v2216_v16 = vpack.c.bf16 %v1608_v13, %v1607_v11  ;;  %v1594_v19 = vld [vmem:[%s3821_s1 + $0x228] sm:$0xff]  ;;  %v1609_v20 = vld [vmem:[%s3821_s1 + $0x2a0] sm:$0xff]  ;;  %s3901_s29 = smov (!%p190_p12, %s189_s29), 3  ;;  %s2638_s4 = smov [#allocation2]  }
  0x1d   : > { %2183 = vmatpush3.bf16.msra.mxu0 %v2182_v8  ;;  %v2186_v17 = vpack.c.bf16 %v1576_v15, %v1575_v14  ;;  %2215 = vmatpush3.bf16.msra.mxu1 %v2212_v7  ;;  %v2188_v21 = vpack.c.bf16 %v1594_v19, %v1593_v18  ;;  %v1610_v22 = vld [vmem:[%s3821_s1 + $0x2a8] sm:$0xff]  ;;  %v1577_v23 = vld [vmem:[%s3821_s1 + $0x1a0] sm:$0xff]  ;;  %v1595_v26 = vld [vmem:[%s3821_s1 + $0x230] sm:$0xff]  ;;  %s2468_s24 = smul.u32 240, %s3901_s29  ;;  %s3720_s29 = scalar_lea.vmem [#allocation2], %s1570_s6 }
  0x1e   : > { %2185 = vmatprep.subr.bf16.mxu0 %v2184_v12  ;;  %v1578_v24 = vld [vmem:[%s3821_s1 + $0x1a8] sm:$0xff]  ;;  %2217 = vmatprep.subr.bf16.mxu1 %v2216_v16  ;;  %v2220_v25 = vpack.c.bf16 %v1610_v22, %v1609_v20  ;;  %v1596_v27 = vld [vmem:[%s3821_s1 + $0x238] sm:$0xff]  ;;  %v1611_v28 = vld [vmem:[%s3821_s1 + $0x2b0] sm:$0xff]  ;;  %s1487_s20 = sshll.u32 %s3720_s29, 4  ;;  %s2546_s6 = sshll.u32 %s2638_s4, 4  ;;  %s3759_s20 = int_to_ptr.vmem [resolvable:$true] %s1487_s20  ;;  %s2547_s6 = int_to_ptr.vmem [resolvable:$false] %s2546_s6 }
  0x1f   : > { %v1612_v29 = vld [vmem:[%s3821_s1 + $0x2b8] sm:$0xff]  ;;  %v2190_v30 = vpack.c.bf16 %v1578_v24, %v1577_v23  ;;  %v2192_v31 = vpack.c.bf16 %v1596_v27, %v1595_v26  ;;  %v1579_v32 = vld [vmem:[%s3821_s1 + $0x1b0] sm:$0xff]  ;;  %v1597_v35 = vld [vmem:[%s3821_s1 + $0x240] sm:$0xff]  ;;  %s2837_s7 = scalar_lea.vmem %s3820_s0, %s2468_s24  ;;  %s1672_s24 = sshll.u32 %s2624_s16, 5 }
  0x20   : > { %v1580_v33 = vld [vmem:[%s3821_s1 + $0x1b8] sm:$0xff]  ;;  %v2224_v34 = vpack.c.bf16 %v1612_v29, %v1611_v28  ;;  %v1598_v36 = vld [vmem:[%s3821_s1 + $0x248] sm:$0xff]  ;;  %v1613_v37 = vld [vmem:[%s3821_s1 + $0x2c0] sm:$0xff]  ;;  %s1484_s15 = sadd.s32 %s1672_s24, %s1671_s11  ;;  %s2542_s28 = scalar_lea.vmem %s3759_s20, 2048 }
  0x21   : > { %2187 = vmatpush3.bf16.msra.mxu0 %v2186_v17  ;;  %2219 = vmatpush3.bf16.msra.mxu1 %v2216_v16  ;;  %v1614_v38 = vld [vmem:[%s3821_s1 + $0x2c8] sm:$0xff]  ;;  %v2194_v39 = vpack.c.bf16 %v1580_v33, %v1579_v32  ;;  %v1581_v40 = vld [vmem:[%s3821_s1 + $0x1c0] sm:$0xff]  ;;  %v2196_v41 = vpack.c.bf16 %v1598_v36, %v1597_v35  ;;  %v1599_v43 = vld [vmem:[%s3821_s1 + $0x250] sm:$0xff]  ;;  %s1673_s16 = sshll.u32 %s1484_s15, 7  ;;  %p2543_p13 = scmp.ne.s32.totalorder %s3759_s20, %s2542_s28 }
  0x22   : > { %2189 = vmatprep.subr.bf16.mxu0 %v2188_v21  ;;  %2221 = vmatprep.subr.bf16.mxu1 %v2220_v25  ;;  %v1582_v42 = vld [vmem:[%s3821_s1 + $0x1c8] sm:$0xff]  ;;  %v1600_v44 = vld [vmem:[%s3821_s1 + $0x258] sm:$0xff]  ;;  %v2228_v45 = vpack.c.bf16 %v1614_v38, %v1613_v37  ;;  %v1615_v46 = vld [vmem:[%s3821_s1 + $0x2d0] sm:$0xff]  ;;  %s3757_s21 = scalar_lea.hbm %s3823_s3, %s1673_s16  ;;  %s2548_s8 = scalar_lea.vmem %s2547_s6, 4096 }
  0x23   : > { %v1616_v47 = vld [vmem:[%s3821_s1 + $0x2d8] sm:$0xff]  ;;  %v2198_v48 = vpack.c.bf16 %v1582_v42, %v1581_v40  ;;  %v2200_v49 = vpack.c.bf16 %v1600_v44, %v1599_v43  ;;  %v2849_v51 = vld [vmem:[%s2837_s7 + $0x20] sm:$0xff]  ;;  %v1583_v52 = vld [vmem:[%s3821_s1 + $0x1d0] sm:$0xff]  ;;  %p2544_p0 = pnand %p2543_p13, %p2712_p3  ;;  %p2549_p2 = scmp.lt.s32.totalorder %s3759_s20, %s2547_s6 }
  0x24   : > { %v2846_v50 = vld [vmem:[%s2837_s7 + $0x18] sm:$0xff]  ;;  %v265_v55 = vrot.slane %v2849_v51, 1  ;;  %v336_v57 = vrot.slane %v2849_v51, 2  ;;  %v2232_v58 = vpack.c.bf16 %v1616_v47, %v1615_v46  ;;  %v1601_v59 = vld [vmem:[%s3821_s1 + $0x260] sm:$0xff]  ;;  %v1602_v60 = vld [vmem:[%s3821_s1 + $0x268] sm:$0xff]  ;;  %p2550_p4 = scmp.lt.s32.totalorder %s2548_s8, %s2542_s28 }
  0x25   : > { %2191 = vmatpush3.bf16.msra.mxu0 %v2190_v30  ;;  %2223 = vmatpush3.bf16.msra.mxu1 %v2220_v25  ;;  %v1584_v53 = vld [vmem:[%s3821_s1 + $0x1d8] sm:$0xff]  ;;  %v264_v54 = vrot.slane %v2846_v50, 1  ;;  %v335_v56 = vrot.slane %v2846_v50, 2  ;;  %v1617_v61 = vld [vmem:[%s3821_s1 + $0x2e0] sm:$0xff]  ;;  %v1618_v62 = vld [vmem:[%s3821_s1 + $0x2e8] sm:$0xff]  ;;  %v2204_v2 = vpack.c.bf16 %v1602_v60, %v1601_v59  ;;  %p2545_p1 = pneg %p2544_p0 }
  0x26   : > { %2193 = vmatprep.subr.bf16.mxu0 %v2192_v31  ;;  %2225 = vmatprep.subr.bf16.mxu1 %v2224_v34  ;;  %v2202_v1 = vpack.c.bf16 %v1584_v53, %v1583_v52  ;;  %v1585_v3 = vld [vmem:[%s3821_s1 + $0x1e0] sm:$0xff]  ;;  %v1586_v4 = vld [vmem:[%s3821_s1 + $0x1e8] sm:$0xff]  ;;  %v2236_v5 = vpack.c.bf16 %v1618_v62, %v1617_v61  ;;  %v1603_v6 = vld [vmem:[%s3821_s1 + $0x270] sm:$0xff]  ;;  %p2551_p5 = por %p2550_p4, %p2549_p2 }
  0x27   : > { %v2876_v63 = vsel %vm258_vm0, %v264_v54, %v265_v55  ;;  %v2881_v0 = vsel %vm329_vm1, %v335_v56, %v336_v57  ;;  %v1604_v7 = vld [vmem:[%s3821_s1 + $0x278] sm:$0xff]  ;;  %v1619_v8 = vld [vmem:[%s3821_s1 + $0x2f0] sm:$0xff]  ;;  %v2206_v10 = vpack.c.bf16 %v1586_v4, %v1585_v3  ;;  %v203_v15 = vld [vmem:[%s2837_s7 + $0x28] sm:$0x3] }
  0x28   : > { %561 = vmatprep.mubr.f32.mxu0 %v2876_v63  ;;  %2044 = vmatprep.mubr.f32.mxu1 %v2881_v0  ;;  %v1620_v9 = vld [vmem:[%s3821_s1 + $0x2f8] sm:$0xff]  ;;  %v2208_v11 = vpack.c.bf16 %v1604_v7, %v1603_v6  ;;  %v1587_v12 = vld [vmem:[%s3821_s1 + $0x1f0] sm:$0xff]  ;;  %v1637_v16 = vld [vmem:[%s3821_s1 + $0x380] sm:$0xff]  ;;  %v338_v23 = vrot.slane %v203_v15, 2  ;;  %v267_v31 = vrot.slane %v203_v15, 1  ;;  %p2552_p6 = pnand %p2551_p5, %p2545_p1 }
  0x29   : > { %2195 = vmatpush3.bf16.msra.mxu0 %v2194_v39  ;;  %2227 = vmatpush3.bf16.msra.mxu1 %v2224_v34  ;;  %v1588_v13 = vld [vmem:[%s3821_s1 + $0x1f8] sm:$0xff]  ;;  %v2240_v14 = vpack.c.bf16 %v1620_v9, %v1619_v8  ;;  %v1638_v17 = vld [vmem:[%s3821_s1 + $0x388] sm:$0xff]  ;;  %v416_v18 = vld [vmem:[%s3821_s1 + $0x80] sm:$0xff] }
  0x2a   : > { %2197 = vmatprep.subr.bf16.mxu0 %v2196_v41  ;;  %2229 = vmatprep.subr.bf16.mxu1 %v2228_v45  ;;  %v417_v19 = vld [vmem:[%s3821_s1 + $0x88] sm:$0xff]  ;;  %v2210_v20 = vpack.c.bf16 %v1588_v13, %v1587_v12  ;;  %v2923_v21 = vld [vmem:[%s2837_s7 + $0x30] sm:$0xff]  ;;  %v2926_v22 = vld [vmem:[%s2837_s7 + $0x38] sm:$0xff]  ;;  %v2308_v24 = vpack.c.bf16 %v1638_v17, %v1637_v16  ;;  %v2967_v42 = vsel %vm329_vm1, %v336_v57, %v338_v23 }
  0x2b   : > { %v1621_v25 = vld [vmem:[%s3821_s1 + $0x300] sm:$0xff]  ;;  %v1622_v26 = vld [vmem:[%s3821_s1 + $0x308] sm:$0xff]  ;;  %v2244_v28 = vpack.c.bf16 %v417_v19, %v416_v18  ;;  %v418_v32 = vld [vmem:[%s3821_s1 + $0x90] sm:$0xff]  ;;  %v340_v33 = vrot.slane %v2923_v21, 2  ;;  %v341_v34 = vrot.slane %v2926_v22, 2  ;;  %3853 = vst [vmem:[#allocation5_spill] sm:$0xff] %v2967_v42 }
  0x2c   : > { %v2935_v27 = vld [vmem:[%s2837_s7 + $0x40] sm:$0x3]  ;;  %v401_v30 = vld [vmem:[%s3821_s1 + $0x8] sm:$0xff]  ;;  %v419_v35 = vld [vmem:[%s3821_s1 + $0x98] sm:$0xff]  ;;  %v2310_v38 = vpack.c.bf16 %v1622_v26, %v1621_v25  ;;  %v269_v46 = vrot.slane %v2923_v21, 1  ;;  %v270_v47 = vrot.slane %v2926_v22, 1 }
  0x2d   : > { %2199 = vmatpush3.bf16.msra.mxu0 %v2198_v48  ;;  %2231 = vmatpush3.bf16.msra.mxu1 %v2228_v45  ;;  %v400_v29 = vld [vmem:[%s3821_s1] sm:$0xff]  ;;  %v2952_v36 = vld [vmem:[%s2837_s7 + $0x48] sm:$0xff]  ;;  %v2955_v37 = vld [vmem:[%s2837_s7 + $0x50] sm:$0xff]  ;;  %v343_v39 = vrot.slane %v2935_v27, 2  ;;  %v2248_v52 = vpack.c.bf16 %v419_v35, %v418_v32 }
  0x2e   : > { %2201 = vmatprep.subr.bf16.mxu0 %v2200_v49  ;;  %2233 = vmatprep.subr.bf16.mxu1 %v2232_v58  ;;  %v1639_v40 = vld [vmem:[%s3821_s1 + $0x390] sm:$0xff]  ;;  %v1640_v41 = vld [vmem:[%s3821_s1 + $0x398] sm:$0xff]  ;;  %v2246_v43 = vpack.c.bf16 %v401_v30, %v400_v29  ;;  %v2983_v49 = vsel %vm258_vm0, %v265_v55, %v267_v31  ;;  %v345_v53 = vrot.slane %v2952_v36, 2  ;;  %v346_v54 = vrot.slane %v2955_v37, 2  ;;  %v420_v56 = vld [vmem:[%s3821_s1 + $0xa0] sm:$0xff] }
  0x2f   : > { %v402_v44 = vld [vmem:[%s3821_s1 + $0x10] sm:$0xff]  ;;  %v403_v45 = vld [vmem:[%s3821_s1 + $0x18] sm:$0xff]  ;;  %v421_v57 = vld [vmem:[%s3821_s1 + $0xa8] sm:$0xff]  ;;  %v2998_v55 = vsel %vm329_vm1, %v340_v33, %v341_v34  ;;  %v2312_v59 = vpack.c.bf16 %v1640_v41, %v1639_v40  ;;  %v3022_v6 = vsel %vm258_vm0, %v269_v46, %v270_v47 }
  0x30   : > { %v2978_v48 = vld [vmem:[%s2837_s7 + $0x58] sm:$0x3]  ;;  %3854 = vst [vmem:[#allocation6_spill] sm:$0xff] %v2998_v55  ;;  %v3004_v61 = vld [vmem:[%s2837_s7 + $0x60] sm:$0xff]  ;;  %v3007_v62 = vld [vmem:[%s2837_s7 + $0x68] sm:$0xff]  ;;  %v2252_v8 = vpack.c.bf16 %v421_v57, %v420_v56  ;;  %v3036_v12 = vsel %vm329_vm1, %v345_v53, %v346_v54 }
  0x31   : > { %2203 = vmatpush3.bf16.msra.mxu0 %v2202_v1  ;;  %2235 = vmatpush3.bf16.msra.mxu1 %v2232_v58  ;;  %v1623_v58 = vld [vmem:[%s3821_s1 + $0x310] sm:$0xff]  ;;  %v1624_v60 = vld [vmem:[%s3821_s1 + $0x318] sm:$0xff]  ;;  %v3011_v1 = vsel %vm329_vm1, %v341_v34, %v343_v39  ;;  %v1641_v3 = vld [vmem:[%s3821_s1 + $0x3a0] sm:$0xff]  ;;  %v348_v7 = vrot.slane %v2978_v48, 2  ;;  %3856 = vst [vmem:[#allocation8_spill] sm:$0xff] %v3036_v12  ;;  %v351_v15 = vrot.slane %v3007_v62, 2 }
  0x32   : > { %2205 = vmatprep.subr.bf16.mxu0 %v2204_v2  ;;  %2237 = vmatprep.subr.bf16.mxu1 %v2236_v5  ;;  %3855 = vst [vmem:[#allocation7_spill] sm:$0xff] %v3011_v1  ;;  %v272_v2 = vrot.slane %v2935_v27, 1  ;;  %v1642_v4 = vld [vmem:[%s3821_s1 + $0x3a8] sm:$0xff]  ;;  %v404_v9 = vld [vmem:[%s3821_s1 + $0x20] sm:$0xff]  ;;  %v2314_v13 = vpack.c.bf16 %v1624_v60, %v1623_v58  ;;  %v422_v16 = vld [vmem:[%s3821_s1 + $0xb0] sm:$0xff]  ;;  %v274_v27 = vrot.slane %v2952_v36, 1 }
  0x33   : > { %v3044_v17 = vld [vmem:[%s2837_s7 + $0x78] sm:$0xff]  ;;  %v3047_v18 = vld [vmem:[%s2837_s7 + $0x80] sm:$0xff]  ;;  %v1643_v29 = vld [vmem:[%s3821_s1 + $0x3b0] sm:$0xff]  ;;  %v3075_v31 = vsel %vm329_vm1, %v346_v54, %v348_v7 }
  0x34   : > { %v423_v19 = vld [vmem:[%s3821_s1 + $0xb8] sm:$0xff]  ;;  %v1625_v23 = vld [vmem:[%s3821_s1 + $0x320] sm:$0xff]  ;;  %v3062_v25 = vsel %vm258_vm0, %v270_v47, %v272_v2  ;;  %3857 = vst [vmem:[#allocation9_spill] sm:$0xff] %v3075_v31  ;;  %v3080_v33 = vld [vmem:[%s3821_s1 + $0x30] sm:$0xff]  ;;  %v355_v35 = vrot.slane %v3044_v17, 2  ;;  %v277_v2 = vrot.slane %v2978_v48, 1 }
  0x35   : > { %2207 = vmatpush3.bf16.msra.mxu0 %v2206_v10  ;;  %2239 = vmatpush3.bf16.msra.mxu1 %v2236_v5  ;;  %v2250_v5 = vpack.c.bf16 %v403_v45, %v402_v44  ;;  %v405_v10 = vld [vmem:[%s3821_s1 + $0x28] sm:$0xff]  ;;  %v1644_v30 = vld [vmem:[%s3821_s1 + $0x3b8] sm:$0xff]  ;;  %v2256_v41 = vpack.c.bf16 %v423_v19, %v422_v16  ;;  %v3106_v46 = vld [vmem:[%s2837_s7 + $0x90] sm:$0xff] }
  0x36   : > { %2209 = vmatprep.subr.bf16.mxu0 %v2208_v11  ;;  %2241 = vmatprep.subr.bf16.mxu1 %v2240_v14  ;;  %v3032_v11 = vld [vmem:[%s2837_s7 + $0x70] sm:$0x3]  ;;  %v2254_v32 = vpack.c.bf16 %v405_v10, %v404_v9  ;;  %v3085_v34 = vld [vmem:[%s3821_s1 + $0x38] sm:$0xff]  ;;  %v3090_v39 = vld [vmem:[%s2837_s7 + $0x88] sm:$0x3]  ;;  %v2320_v54 = vpack.c.bf16 %v1644_v30, %v1643_v29 }
  0x37   : > { %v353_v26 = vrot.slane %v3032_v11, 2  ;;  %v3103_v44 = vld [vmem:[%s3821_s1 + $0xc8] sm:$0xff]  ;;  %v3112_v47 = vld [vmem:[%s3821_s1 + $0x40] sm:$0xff]  ;;  %v3120_v53 = vld [vmem:[%s2837_s7 + $0x98] sm:$0xff]  ;;  %v358_v60 = vrot.slane %v3090_v39, 2  ;;  %v2258_v7 = vpack.c.bf16 %v3085_v34, %v3080_v33 }
  0x38   : > { %v1627_v56 = vld [vmem:[%s3821_s1 + $0x330] sm:$0xff]  ;;  %v1628_v57 = vld [vmem:[%s3821_s1 + $0x338] sm:$0xff]  ;;  %v3158_v9 = vld [vmem:[%s2837_s7 + $0xa0] sm:$0x3]  ;;  %v361_v16 = vrot.slane %v3120_v53, 2 }
  0x39   : > { %2211 = vmatpush3.bf16.msra.mxu0 %v2210_v20  ;;  %2243 = vmatpush3.bf16.msra.mxu1 %v2240_v14  ;;  %v350_v14 = vrot.slane %v3004_v61, 2  ;;  %v2316_v20 = vpack.c.bf16 %v1642_v4, %v1641_v3  ;;  %v3131_v58 = vsel %vm329_vm1, %v351_v15, %v353_v26  ;;  %v1645_v3 = vld [vmem:[%s3821_s1 + $0x3c0] sm:$0xff]  ;;  %v1646_v4 = vld [vmem:[%s3821_s1 + $0x3c8] sm:$0xff]  ;;  %v3163_v10 = vld [vmem:[%s3821_s1 + $0xd0] sm:$0xff] }
  0x3a   : > { %2309 = vmatprep.subr.bf16.mxu0 %v2308_v24  ;;  %2245 = vmatprep.subr.bf16.mxu1 %v2244_v28  ;;  %v1626_v24 = vld [vmem:[%s3821_s1 + $0x328] sm:$0xff]  ;;  %v275_v28 = vrot.slane %v2955_v37, 1  ;;  %3859 = vst [vmem:[#allocation11_spill] sm:$0xff] %v3131_v58  ;;  %v3174_v19 = vld [vmem:[%s3821_s1 + $0xd8] sm:$0xff]  ;;  %v3186_v29 = vld [vmem:[%s2837_s7 + $0xb0] sm:$0xff]  ;;  %v2324_v30 = vpack.c.bf16 %v1646_v4, %v1645_v3 }
  0x3b   : > { %v3093_v40 = vsel %vm329_vm1, %v350_v14, %v351_v15  ;;  %v2318_v45 = vpack.c.bf16 %v1626_v24, %v1625_v23  ;;  %v360_v15 = vrot.slane %v3106_v46, 2  ;;  %v2322_v23 = vpack.c.bf16 %v1628_v57, %v1627_v56  ;;  %v3180_v24 = vld [vmem:[%s2837_s7 + $0x8] sm:$0xff]  ;;  %v3227_v56 = vld [vmem:[%s2837_s7 + $0xb8] sm:$0x3]  ;;  %v3232_v57 = vld [vmem:[%s3821_s1 + $0xe0] sm:$0xff] }
  0x3c   : > { %562 = vmatmul.mubr.f32.vlgmr.msra.gmra.mrb[0].mxu0 %v2846_v50  ;;  %2045 = vmatmul.mubr.f32.vlgmr.msra.gmra.mrb[0].mxu1 %v2967_v42  ;;  %3858 = vst [vmem:[#allocation10_spill] sm:$0xff] %v3093_v40  ;;  %v1630_v33 = vld [vmem:[%s3821_s1 + $0x348] sm:$0xff]  ;;  %v331_v34 = vrot.slane %v3180_v24, 2 }
  0x3d   : > { %2311 = vmatpush3.bf16.msra.mxu0 %v2310_v38  ;;  %2247 = vmatpush3.bf16.msra.mxu1 %v2246_v43  ;;  %v356_v38 = vrot.slane %v3047_v18, 2  ;;  %v3098_v43 = vld [vmem:[%s3821_s1 + $0xc0] sm:$0xff]  ;;  %v3241_v3 = vsel %vm329_vm1, %v360_v15, %v361_v16 }
  0x3e   : > { %566 = vmatprep.mubr.f32.mxu0 %v2983_v49  ;;  %2047 = vmatprep.mubr.f32.mxu1 %v2998_v55  ;;  %3862 = vst [vmem:[#allocation14_spill] sm:$0xff] %v3241_v3 }
  0x3f   : > { %2249 = vmatprep.subr.bf16.mxu1 %v2248_v52  ;;  %2313 = vmatprep.subr.bf16.mxu0 %v2312_v59  ;;  %v3117_v52 = vld [vmem:[%s3821_s1 + $0x48] sm:$0xff]  ;;  %v3136_v59 = vsel %vm258_vm0, %v274_v27, %v275_v28  ;;  %v3153_v48 = vsel %vm329_vm1, %v355_v35, %v356_v38  ;;  %v279_v27 = vrot.slane %v3004_v61, 1  ;;  %v3198_v35 = vsel %vm329_vm1, %v356_v38, %v358_v60  ;;  %v1647_v38 = vld [vmem:[%s3821_s1 + $0x3d0] sm:$0xff] }
  0x40   : > { %567 = vmatmul.mubr.f32.gmra.mrb[2].mxu0 %v2849_v51  ;;  %2048 = vmatmul.mubr.f32.gmra.mrb[2].mxu1 %v3011_v1  ;;  %3860 = vst [vmem:[#allocation12_spill] sm:$0xff] %v3153_v48  ;;  %3861 = vst [vmem:[#allocation13_spill] sm:$0xff] %v3198_v35 }
  0x41   : > { %571 = vmatprep.mubr.f32.mxu0 %v3022_v6  ;;  %2251 = vmatpush3.bf16.msra.mxu1 %v2250_v5  ;;  %v3147_v5 = vld [vmem:[%s2837_s7 + $0x10] sm:$0x3] }
  0x42   : > { %2050 = vmatprep.mubr.f32.mxu1 %v3036_v12  ;;  %2253 = vmatprep.subr.bf16.mxu1 %v2252_v8  ;;  %v2260_v8 = vpack.c.bf16 %v3103_v44, %v3098_v43  ;;  %v333_v14 = vrot.slane %v3147_v5, 2  ;;  %v3205_v43 = vsel %vm258_vm0, %v275_v28, %v277_v2  ;;  %v3210_v44 = vld [vmem:[%s3821_s1 + $0x50] sm:$0xff]  ;;  %v363_v28 = vrot.slane %v3158_v9, 2  ;;  %v227_v12 = vld [vmem:[%s2837_s7 + $0xe8] sm:$0x3] }
  0x43   : > { %2315 = vmatpush3.bf16.msra.mxu0 %v2314_v13  ;;  %v3166_v13 = vld [vmem:[%s2837_s7] sm:$0xff] }
  0x44   : > { %572 = vmatmul.mubr.f32.gmra.mrb[4].mxu0 %v2923_v21  ;;  %2317 = vmatprep.subr.bf16.mxu0 %v2316_v20  ;;  %v3177_v20 = vld [vmem:[%s2837_s7 + $0xa8] sm:$0xff]  ;;  %v330_v26 = vrot.slane %v3166_v13, 2  ;;  %v3238_v2 = vsel %vm329_vm1, %v331_v34, %v333_v14  ;;  %v282_v14 = vrot.slane %v3032_v11, 1  ;;  %v368_v11 = vrot.slane %v3227_v56, 2 }
  0x45   : > { %2051 = vmatmul.mubr.f32.gmra.mrb[4].mxu1 %v3075_v31  ;;  %576 = vmatprep.mubr.f32.mxu0 %v3062_v25  ;;  %v365_v4 = vrot.slane %v3177_v20, 2  ;;  %v3297_v31 = vld [vmem:[%s3821_s1 + $0xf0] sm:$0xff] }
  0x46   : > { %2255 = vmatpush3.bf16.msra.mxu1 %v2254_v32  ;;  %2053 = vmatprep.mubr.f32.mxu1 %v3093_v40  ;;  %v1629_v32 = vld [vmem:[%s3821_s1 + $0x340] sm:$0xff]  ;;  %v3235_v60 = vsel %vm329_vm1, %v330_v26, %v331_v34  ;;  %v3252_v26 = vld [vmem:[%s2837_s7 + $0xc8] sm:$0xff]  ;;  %v3292_v40 = vld [vmem:[%s2837_s7 + $0xd0] sm:$0x3] }
  0x47   : > { %2257 = vmatprep.subr.bf16.mxu1 %v2256_v41  ;;  %2319 = vmatpush3.bf16.msra.mxu0 %v2318_v45  ;;  %v2262_v41 = vpack.c.bf16 %v3117_v52, %v3112_v47  ;;  %v280_v45 = vrot.slane %v3007_v62, 1  ;;  %v1648_v47 = vld [vmem:[%s3821_s1 + $0x3d8] sm:$0xff]  ;;  %v2264_v52 = vpack.c.bf16 %v3174_v19, %v3163_v10  ;;  %v429_v10 = vld [vmem:[%s3821_s1 + $0xe8] sm:$0xff]  ;;  %v3249_v19 = vld [vmem:[%s2837_s7 + $0xc0] sm:$0xff] }
  0x48   : > { %577 = vmatmul.mubr.f32.gmra.mrb[6].mxu0 %v2926_v22  ;;  %2321 = vmatprep.subr.bf16.mxu0 %v2320_v54  ;;  %v411_v54 = vld [vmem:[%s3821_s1 + $0x58] sm:$0xff]  ;;  %v2328_v15 = vpack.c.bf16 %v1648_v47, %v1647_v38  ;;  %v1649_v34 = vld [vmem:[%s3821_s1 + $0x3e0] sm:$0xff]  ;;  %v1650_v38 = vld [vmem:[%s3821_s1 + $0x3e8] sm:$0xff] }
  0x49   : > { %2054 = vmatmul.mubr.f32.gmra.mrb[6].mxu1 %v3131_v58  ;;  %581 = vmatprep.mubr.f32.mxu0 %v3136_v59  ;;  %v2266_v47 = vpack.c.bf16 %v411_v54, %v3210_v44  ;;  %v371_v58 = vrot.slane %v3252_v26, 2  ;;  %v2268_v44 = vpack.c.bf16 %v429_v10, %v3232_v57  ;;  %v3310_v54 = vsel %vm258_vm0, %v280_v45, %v282_v14  ;;  %v1651_v14 = vld [vmem:[%s3821_s1 + $0x3f0] sm:$0xff] }
  0x4a   : > { %2259 = vmatpush3.bf16.msra.mxu1 %v2258_v7  ;;  %2056 = vmatprep.mubr.f32.mxu1 %v3153_v48  ;;  %v366_v7 = vrot.slane %v3186_v29, 2  ;;  %v2326_v48 = vpack.c.bf16 %v1630_v33, %v1629_v32  ;;  %v1632_v32 = vld [vmem:[%s3821_s1 + $0x358] sm:$0xff]  ;;  %v3270_v33 = vsel %vm258_vm0, %v279_v27, %v280_v45  ;;  %v3286_v27 = vsel %vm329_vm1, %v361_v16, %v363_v28 }
  0x4b   : > { %2261 = vmatprep.subr.bf16.mxu1 %v2260_v8  ;;  %2323 = vmatpush3.bf16.msra.mxu0 %v2322_v23  ;;  %v3258_v8 = vld [vmem:[%s3821_s1 + $0x60] sm:$0xff]  ;;  %v1631_v23 = vld [vmem:[%s3821_s1 + $0x350] sm:$0xff]  ;;  %3863 = vst [vmem:[#allocation15_spill] sm:$0xff] %v3286_v27  ;;  %v2332_v1 = vpack.c.bf16 %v1650_v38, %v1649_v34 }
  0x4c   : > { %582 = vmatmul.mubr.f32.gmra.mrb[8].mxu0 %v2952_v36  ;;  %2325 = vmatprep.subr.bf16.mxu0 %v2324_v30  ;;  %v3276_v30 = vld [vmem:[%s3821_s1 + $0x68] sm:$0xff]  ;;  %v3305_v16 = vsel %vm329_vm1, %v365_v4, %v366_v7  ;;  %v2330_v28 = vpack.c.bf16 %v1632_v32, %v1631_v23  ;;  %v3323_v45 = vsel %vm329_vm1, %v366_v7, %v368_v11  ;;  %v373_v4 = vrot.slane %v3292_v40, 2  ;;  %v3337_v23 = vld [vmem:[%s2837_s7 + $0xd8] sm:$0xff]  ;;  %v3351_v11 = vld [vmem:[%s2837_s7 + $0xe0] sm:$0xff] }
  0x4d   : > { %2057 = vmatmul.mubr.f32.gmra.mrb[8].mxu1 %v3198_v35  ;;  %586 = vmatprep.mubr.f32.mxu0 %v3205_v43  ;;  %v370_v35 = vrot.slane %v3249_v19, 2  ;;  %3864 = vst [vmem:[#allocation16_spill] sm:$0xff] %v3305_v16  ;;  %3865 = vst [vmem:[#allocation17_spill] sm:$0xff] %v3323_v45  ;;  %v2270_v57 = vpack.c.bf16 %v3276_v30, %v3258_v8  ;;  %v415_v8 = vld [vmem:[%s3821_s1 + $0x78] sm:$0xff]  ;;  %v259_v32 = vrot.slane %v3166_v13, 1  ;;  %v304_v30 = vrot.slane %v3337_v23, 1 }
  0x4e   : > { %2263 = vmatpush3.bf16.msra.mxu1 %v2262_v41  ;;  %2059 = vmatprep.mubr.f32.mxu1 %v3241_v3  ;;  %v3302_v41 = vld [vmem:[%s3821_s1 + $0xf8] sm:$0xff]  ;;  %v284_v3 = vrot.slane %v3044_v17, 1  ;;  %3866 = vst [vmem:[#allocation18_spill] sm:$0xff] %v3337_v23  ;;  %3867 = vst [vmem:[#allocation19_spill] sm:$0xff] %v3351_v11  ;;  %v375_v34 = vrot.slane %v3337_v23, 2  ;;  %v432_v38 = vld [vmem:[%s3821_s1 + $0x100] sm:$0xff] }
  0x4f   : > { %2265 = vmatprep.subr.bf16.mxu1 %v2264_v52  ;;  %2327 = vmatpush3.bf16.msra.mxu0 %v2326_v48  ;;  %v1633_v52 = vld [vmem:[%s3821_s1 + $0x360] sm:$0xff]  ;;  %v1634_v48 = vld [vmem:[%s3821_s1 + $0x368] sm:$0xff]  ;;  %v2272_v10 = vpack.c.bf16 %v3302_v41, %v3297_v31  ;;  %v3341_v7 = vsel %vm329_vm1, %v370_v35, %v371_v58  ;;  %v414_v31 = vld [vmem:[%s3821_s1 + $0x70] sm:$0xff]  ;;  %v260_v35 = vrot.slane %v3180_v24, 1  ;;  %v305_v41 = vrot.slane %v3351_v11, 1 }
  0x50   : > { %587 = vmatmul.mubr.f32.gmra.mrb[10].mxu0 %v2955_v37  ;;  %2329 = vmatprep.subr.bf16.mxu0 %v2328_v15  ;;  %v1652_v15 = vld [vmem:[%s3821_s1 + $0x3f8] sm:$0xff] }
  0x51   : > { %2060 = vmatmul.mubr.f32.gmra.mrb[10].mxu1 %v3286_v27  ;;  %591 = vmatprep.mubr.f32.mxu0 %v3270_v33  ;;  %v3868_v27 = vrot.slane %v3047_v18, 1  ;;  %v2336_v55 = vpack.c.bf16 %v1652_v15, %v1651_v14  ;;  %v3389_v14 = vsel %vm258_vm0, %v304_v30, %v305_v41  ;;  %v2274_v15 = vpack.c.bf16 %v415_v8, %v414_v31 }
  0x52   : > { %2267 = vmatpush3.bf16.msra.mxu1 %v2266_v47  ;;  %2062 = vmatprep.mubr.f32.mxu1 %v3305_v16  ;;  %v2334_v47 = vpack.c.bf16 %v1634_v48, %v1633_v52  ;;  %v376_v16 = vrot.slane %v3351_v11, 2  ;;  %v1636_v52 = vld [vmem:[%s3821_s1 + $0x378] sm:$0xff]  ;;  %v307_v48 = vrot.slane %v227_v12, 1  ;;  %v378_v11 = vrot.slane %v227_v12, 2  ;;  %3869 = vst [vmem:[#allocation20_spill] sm:$0xff] %v3389_v14 }
  0x53   : > { %2269 = vmatprep.subr.bf16.mxu1 %v2268_v44  ;;  %2331 = vmatpush3.bf16.msra.mxu0 %v2330_v28  ;;  %v3366_v23 = vsel %vm258_vm0, %v284_v3, %v3868_v27  ;;  %v433_v44 = vld [vmem:[%s3821_s1 + $0x108] sm:$0xff]  ;;  %v1635_v28 = vld [vmem:[%s3821_s1 + $0x370] sm:$0xff]  ;;  %v3380_v3 = vsel %vm329_vm1, %v371_v58, %v373_v4  ;;  %v287_v58 = vrot.slane %v3090_v39, 1  ;;  %v261_v42 = vsel %vm258_vm0, %v259_v32, %v260_v35 }
  0x54   : > { %592 = vmatmul.mubr.f32.gmra.mrb[12].mxu0 %v3004_v61  ;;  %2333 = vmatprep.subr.bf16.mxu0 %v2332_v1  ;;  %v1653_v1 = vld [vmem:[%s3821_s1 + $0x400] sm:$0xff]  ;;  %v1654_v27 = vld [vmem:[%s3821_s1 + $0x408] sm:$0xff]  ;;  %v3392_v12 = vsel %vm329_vm1, %v375_v34, %v376_v16  ;;  %v3397_v4 = vsel %vm258_vm0, %v305_v41, %v307_v48  ;;  %v2276_v30 = vpack.c.bf16 %v433_v44, %v432_v38  ;;  %v262_v14 = vrot.slane %v3147_v5, 1  ;;  %v434_v39 = vld [vmem:[%s3821_s1 + $0x110] sm:$0xff] }
  0x55   : > { %2063 = vmatmul.mubr.f32.gmra.mrb[12].mxu1 %v3323_v45  ;;  %596 = vmatprep.mubr.f32.mxu0 %v3310_v54  ;;  %v3400_v45 = vsel %vm329_vm1, %v376_v16, %v378_v11  ;;  %v2338_v34 = vpack.c.bf16 %v1636_v52, %v1635_v28  ;;  %v3411_v16 = vpack.c.bf16 %v1654_v27, %v1653_v1  ;;  %v3870_v5 = vrot.slane %v3047_v18, 1  ;;  %v437_v11 = vld [vmem:[%s3821_s1 + $0x128] sm:$0xff]  ;;  %v438_v41 = vld [vmem:[%s3821_s1 + $0x130] sm:$0xff] }
  0x56   : > { %2271 = vmatpush3.bf16.msra.mxu1 %v2270_v57  ;;  %2065 = vmatprep.mubr.f32.mxu1 %v3341_v7  ;;  %v435_v57 = vld [vmem:[%s3821_s1 + $0x118] sm:$0xff]  ;;  %v289_v31 = vrot.slane %v3106_v46, 1  ;;  %v290_v8 = vrot.slane %v3120_v53, 1  ;;  %v292_v38 = vrot.slane %v3158_v9, 1  ;;  %v294_v44 = vrot.slane %v3177_v20, 1 }
  0x57   : > { %2273 = vmatprep.subr.bf16.mxu1 %v2272_v10  ;;  %2335 = vmatpush3.bf16.msra.mxu0 %v2334_v47  ;;  %v3418_v10 = vsel %vm258_vm0, %v3870_v5, %v287_v58  ;;  %v2280_v32 = vpack.c.bf16 %v435_v57, %v434_v39  ;;  %v295_v28 = vrot.slane %v3186_v29, 1  ;;  %v297_v1 = vrot.slane %v3227_v56, 1  ;;  %v446_v5 = vld [vmem:[%s3821_s1 + $0x170] sm:$0xff] }
  0x58   : > { %597 = vmatmul.mubr.f32.gmra.mrb[14].mxu0 %v3007_v62  ;;  %2337 = vmatprep.subr.bf16.mxu0 %v2336_v55  ;;  %v263_v55 = vsel %vm258_vm0, %v260_v35, %v262_v14  ;;  %v3434_v35 = vsel %vm258_vm0, %v289_v31, %v290_v8  ;;  %v3448_v9 = vsel %vm258_vm0, %v290_v8, %v292_v38  ;;  %v442_v14 = vld [vmem:[%s3821_s1 + $0x150] sm:$0xff]  ;;  %v299_v56 = vrot.slane %v3249_v19, 1  ;;  %v447_v31 = vld [vmem:[%s3821_s1 + $0x178] sm:$0xff]  ;;  %v1658_v38 = vld [vmem:[%s3821_s1 + $0x428] sm:$0xff] }
  0x59   : > { %2066 = vmatmul.mubr.f32.gmra.mrb[14].mxu1 %v3380_v3  ;;  %601 = vmatprep.mubr.f32.mxu0 %v3366_v23  ;;  %v3463_v48 = vsel %vm258_vm0, %v294_v44, %v295_v28  ;;  %v302_v39 = vrot.slane %v3292_v40, 1  ;;  %v2304_v8 = vpack.c.bf16 %v447_v31, %v446_v5  ;;  %v1666_v44 = vld [vmem:[%s3821_s1 + $0x468] sm:$0xff] }
  0x5a   : > { %2275 = vmatpush3.bf16.msra.mxu1 %v2274_v15  ;;  %851 = vmatprep.mubr.f32.mxu1 %v261_v42  ;;  %v436_v42 = vld [vmem:[%s3821_s1 + $0x120] sm:$0xff]  ;;  %v300_v15 = vrot.slane %v3252_v26, 1 }
  0x5b   : > { %2277 = vmatprep.subr.bf16.mxu1 %v2276_v30  ;;  %2339 = vmatpush3.bf16.msra.mxu0 %v2338_v34  ;;  %v2284_v47 = vpack.c.bf16 %v437_v11, %v436_v42  ;;  %v1657_v11 = vld [vmem:[%s3821_s1 + $0x420] sm:$0xff] }
  0x5c   : > { %602 = vmatmul.mubr.f32.gmra.mrb[16].mxu0 %v3044_v17  ;;  %2341 = vmatprep.subr.bf16.mxu0 %v3411_v16  ;;  %v3492_v34 = vsel %vm258_vm0, %v299_v56, %v300_v15  ;;  %v3506_v40 = vsel %vm258_vm0, %v300_v15, %v302_v39 }
  0x5d   : > { %852 = vmatmul.mubr.f32.vlgmr.msra.gmra.mrb[16].mxu1 %v3166_v13  ;;  %606 = vmatprep.mubr.f32.mxu0 %v3418_v10  ;;  %v439_v13 = vld [vmem:[%s3821_s1 + $0x138] sm:$0xff] }
  0x5e   : > { %2279 = vmatpush3.bf16.msra.mxu1 %v2276_v30  ;;  %856 = vmatprep.mubr.f32.mxu1 %v263_v55  ;;  %v2288_v52 = vpack.c.bf16 %v439_v13, %v438_v41  ;;  %v445_v30 = vld [vmem:[%s3821_s1 + $0x168] sm:$0xff]  ;;  %v1655_v55 = vld [vmem:[%s3821_s1 + $0x410] sm:$0xff]  ;;  %v1664_v13 = vld [vmem:[%s3821_s1 + $0x458] sm:$0xff] }
  0x5f   : > { %2281 = vmatprep.subr.bf16.mxu1 %v2280_v32  ;;  %v1662_v41 = vld [vmem:[%s3821_s1 + $0x448] sm:$0xff] }
  0x60   : > { %607 = vmatmul.mubr.f32.gmra.mrb[18].mxu0 %v3047_v18 }
  0x61   : > { %857 = vmatmul.mubr.f32.gmra.mrb[18].mxu1 %v3180_v24  ;;  %611 = vmatprep.mubr.f32.mxu0 %v3434_v35  ;;  %v440_v24 = vld [vmem:[%s3821_s1 + $0x140] sm:$0xff] }
  0x62   : > { %861 = vmatprep.mubr.f32.mxu1 %v2876_v63  ;;  %2283 = vmatpush3.bf16.msra.mxu1 %v2280_v32  ;;  %v441_v63 = vld [vmem:[%s3821_s1 + $0x148] sm:$0xff]  ;;  %v1656_v32 = vld [vmem:[%s3821_s1 + $0x418] sm:$0xff] }
  0x63   : > { %2285 = vmatprep.subr.bf16.mxu1 %v2284_v47  ;;  %v2292_v27 = vpack.c.bf16 %v441_v63, %v440_v24  ;;  %v3522_v42 = vpack.c.bf16 %v1656_v32, %v1655_v55 }
  0x64   : > { %612 = vmatmul.mubr.f32.gmra.mrb[20].mxu0 %v3106_v46 }
  0x65   : > { %862 = vmatmul.mubr.f32.gmra.mrb[20].mxu1 %v2846_v50  ;;  %616 = vmatprep.mubr.f32.mxu0 %v3448_v9  ;;  %v443_v50 = vld [vmem:[%s3821_s1 + $0x158] sm:$0xff] }
  0x66   : > { %866 = vmatprep.mubr.f32.mxu1 %v2983_v49  ;;  %2287 = vmatpush3.bf16.msra.mxu1 %v2284_v47  ;;  %v3477_v49 = vsel %vm258_vm0, %v295_v28, %v297_v1  ;;  %v2296_v58 = vpack.c.bf16 %v443_v50, %v442_v14  ;;  %v1660_v47 = vld [vmem:[%s3821_s1 + $0x438] sm:$0xff] }
  0x67   : > { %2289 = vmatprep.subr.bf16.mxu1 %v2288_v52  ;;  %v1668_v28 = vld [vmem:[%s3821_s1 + $0x478] sm:$0xff] }
  0x68   : > { %617 = vmatmul.mubr.f32.gmra.mrb[22].mxu0 %v3120_v53 }
  0x69   : > { %867 = vmatmul.mubr.f32.gmra.mrb[22].mxu1 %v2849_v51  ;;  %621 = vmatprep.mubr.f32.mxu0 %v3463_v48  ;;  %v444_v51 = vld [vmem:[%s3821_s1 + $0x160] sm:$0xff] }
  0x6a   : > { %871 = vmatprep.mubr.f32.mxu1 %v3022_v6  ;;  %2291 = vmatpush3.bf16.msra.mxu1 %v2288_v52  ;;  %v2300_v57 = vpack.c.bf16 %v445_v30, %v444_v51 }
  0x6b   : > { %2293 = vmatprep.subr.bf16.mxu1 %v2292_v27 }
  0x6c   : > { %622 = vmatmul.mubr.f32.gmra.mrb[24].mxu0 %v3177_v20 }
  0x6d   : > { %872 = vmatmul.mubr.f32.gmra.mrb[24].mxu1 %v2923_v21  ;;  %626 = vmatprep.mubr.f32.mxu0 %v3477_v49 }
  0x6e   : > { %876 = vmatprep.mubr.f32.mxu1 %v3062_v25  ;;  %2295 = vmatpush3.bf16.msra.mxu1 %v2292_v27 }
  0x6f   : > { %2297 = vmatprep.subr.bf16.mxu1 %v2296_v58 }
  0x70   : > { %627 = vmatmul.mubr.f32.gmra.mrb[26].mxu0 %v3186_v29 }
  0x71   : > { %877 = vmatmul.mubr.f32.gmra.mrb[26].mxu1 %v2926_v22  ;;  %631 = vmatprep.mubr.f32.mxu0 %v3492_v34 }
  0x72   : > { %881 = vmatprep.mubr.f32.mxu1 %v3136_v59  ;;  %2299 = vmatpush3.bf16.msra.mxu1 %v2296_v58 }
  0x73   : > { %2301 = vmatprep.subr.bf16.mxu1 %v2300_v57 }
  0x74   : > { %632 = vmatmul.mubr.f32.gmra.mrb[28].mxu0 %v3249_v19 }
  0x75   : > { %882 = vmatmul.mubr.f32.gmra.mrb[28].mxu1 %v2952_v36  ;;  %636 = vmatprep.mubr.f32.mxu0 %v3506_v40 }
  0x76   : > { %886 = vmatprep.mubr.f32.mxu1 %v3205_v43  ;;  %2303 = vmatpush3.bf16.msra.mxu1 %v2300_v57 }
  0x77   : > { %2305 = vmatprep.subr.bf16.mxu1 %v2304_v8 }
  0x78   : > { %637 = vmatmul.mubr.f32.gmra.mrb[30].mxu0 %v3252_v26 }
  0x79   : > { %887 = vmatmul.mubr.f32.gmra.mrb[30].mxu1 %v2955_v37  ;;  %1190 = vmatprep.mubr.f32.mxu0 %v3022_v6  ;;  %v3537_v6 = vpack.c.bf16 %v1658_v38, %v1657_v11 }
  0x7a   : > { %891 = vmatprep.mubr.f32.mxu1 %v3270_v33  ;;  %2307 = vmatpush3.bf16.msra.mxu1 %v2304_v8 }
  0x7b   : > { %2372 = vmatprep.subr.bf16.mxu1 %v3411_v16 }
  0x7c   : > { %1191 = vmatmul.mubr.f32.vlgmr.msra.gmra.mrb[32].mxu0 %v2923_v21  ;;  %v1659_v21 = vld [vmem:[%s3821_s1 + $0x430] sm:$0xff] }
  0x7d   : > { %892 = vmatmul.mubr.f32.gmra.mrb[32].mxu1 %v3004_v61  ;;  %2343 = vmatpush3.bf16.msra.mxu0 %v3411_v16 }
  0x7e   : > { %896 = vmatprep.mubr.f32.mxu1 %v3310_v54  ;;  %1195 = vmatprep.mubr.f32.mxu0 %v3062_v25  ;;  %v3551_v25 = vpack.c.bf16 %v1660_v47, %v1659_v21 }
  0x7f   : > { %2345 = vmatprep.subr.bf16.mxu0 %v3522_v42 }
  0x80   : > { %1196 = vmatmul.mubr.f32.gmra.mrb[34].mxu0 %v2926_v22  ;;  %v1661_v22 = vld [vmem:[%s3821_s1 + $0x440] sm:$0xff] }
  0x81   : > { %897 = vmatmul.mubr.f32.gmra.mrb[34].mxu1 %v3007_v62  ;;  %1200 = vmatprep.mubr.f32.mxu0 %v3136_v59  ;;  %v3565_v59 = vpack.c.bf16 %v1662_v41, %v1661_v22 }
  0x82   : > { %901 = vmatprep.mubr.f32.mxu1 %v3366_v23  ;;  %2347 = vmatpush3.bf16.msra.mxu0 %v3522_v42 }
  0x83   : > { %2349 = vmatprep.subr.bf16.mxu0 %v3537_v6 }
  0x84   : > { %1201 = vmatmul.mubr.f32.gmra.mrb[36].mxu0 %v2952_v36  ;;  %v1663_v36 = vld [vmem:[%s3821_s1 + $0x450] sm:$0xff] }
  0x85   : > { %902 = vmatmul.mubr.f32.gmra.mrb[36].mxu1 %v3044_v17  ;;  %1205 = vmatprep.mubr.f32.mxu0 %v3205_v43  ;;  %v2360_v43 = vpack.c.bf16 %v1664_v13, %v1663_v36 }
  0x86   : > { %906 = vmatprep.mubr.f32.mxu1 %v3418_v10  ;;  %2351 = vmatpush3.bf16.msra.mxu0 %v3537_v6 }
  0x87   : > { %2353 = vmatprep.subr.bf16.mxu0 %v3551_v25 }
  0x88   : > { %1206 = vmatmul.mubr.f32.gmra.mrb[38].mxu0 %v2955_v37  ;;  %v1665_v37 = vld [vmem:[%s3821_s1 + $0x460] sm:$0xff] }
  0x89   : > { %907 = vmatmul.mubr.f32.gmra.mrb[38].mxu1 %v3047_v18  ;;  %1210 = vmatprep.mubr.f32.mxu0 %v3270_v33  ;;  %v2364_v33 = vpack.c.bf16 %v1666_v44, %v1665_v37 }
  0x8a   : > { %911 = vmatprep.mubr.f32.mxu1 %v3434_v35  ;;  %2355 = vmatpush3.bf16.msra.mxu0 %v3551_v25 }
  0x8b   : > { %2357 = vmatprep.subr.bf16.mxu0 %v3565_v59 }
  0x8c   : > { %1211 = vmatmul.mubr.f32.gmra.mrb[40].mxu0 %v3004_v61  ;;  %v1667_v61 = vld [vmem:[%s3821_s1 + $0x470] sm:$0xff] }
  0x8d   : > { %912 = vmatmul.mubr.f32.gmra.mrb[40].mxu1 %v3106_v46  ;;  %1215 = vmatprep.mubr.f32.mxu0 %v3310_v54  ;;  %v2368_v54 = vpack.c.bf16 %v1668_v28, %v1667_v61 }
  0x8e   : > { %916 = vmatprep.mubr.f32.mxu1 %v3448_v9  ;;  %2359 = vmatpush3.bf16.msra.mxu0 %v3565_v59 }
  0x8f   : > { %2361 = vmatprep.subr.bf16.mxu0 %v2360_v43 }
  0x90   : > { %1216 = vmatmul.mubr.f32.gmra.mrb[42].mxu0 %v3007_v62  ;;  %v3871_v62 = vld [vmem:[#allocation5_spill] sm:$0xff] }
  0x91   : > { %917 = vmatmul.mubr.f32.gmra.mrb[42].mxu1 %v3120_v53  ;;  %1220 = vmatprep.mubr.f32.mxu0 %v3366_v23  ;;  %v3881_v23 = vld [vmem:[#allocation14_spill] sm:$0xff] }
  0x92   : > { %921 = vmatprep.mubr.f32.mxu1 %v3463_v48  ;;  %2363 = vmatpush3.bf16.msra.mxu0 %v2360_v43 }
  0x93   : > { %2365 = vmatprep.subr.bf16.mxu0 %v2364_v33 }
  0x94   : > { %1221 = vmatmul.mubr.f32.gmra.mrb[44].mxu0 %v3044_v17  ;;  %v3872_v17 = vld [vmem:[#allocation6_spill] sm:$0xff] }
  0x95   : > { %922 = vmatmul.mubr.f32.gmra.mrb[44].mxu1 %v3177_v20  ;;  %1225 = vmatprep.mubr.f32.mxu0 %v3418_v10  ;;  %v3884_v10 = vld [vmem:[#allocation16_spill] sm:$0xff] }
  0x96   : > { %926 = vmatprep.mubr.f32.mxu1 %v3477_v49  ;;  %2367 = vmatpush3.bf16.msra.mxu0 %v2364_v33 }
  0x97   : > { %2369 = vmatprep.subr.bf16.mxu0 %v2368_v54 }
  0x98   : > { %1226 = vmatmul.mubr.f32.gmra.mrb[46].mxu0 %v3047_v18  ;;  %v3873_v18 = vld [vmem:[#allocation7_spill] sm:$0xff] }
  0x99   : > { %927 = vmatmul.mubr.f32.gmra.mrb[46].mxu1 %v3186_v29  ;;  %1230 = vmatprep.mubr.f32.mxu0 %v3434_v35  ;;  %v3885_v35 = vld [vmem:[#allocation19_spill] sm:$0xff] }
  0x9a   : > { %2100 = vmatprep.mubr.f32.mxu1 %v3235_v60  ;;  %2371 = vmatpush3.bf16.msra.mxu0 %v2368_v54  ;;  %v3878_v60 = vld [vmem:[#allocation12_spill] sm:$0xff] }
  0x9c   : > { %1231 = vmatmul.mubr.f32.gmra.mrb[48].mxu0 %v3106_v46  ;;  %v3875_v46 = vld [vmem:[#allocation9_spill] sm:$0xff] }
  0x9d   : > { %2101 = vmatmul.mubr.f32.vlgmr.msra.gmra.mrb[0].mxu1 %v3238_v2  ;;  %1235 = vmatprep.mubr.f32.mxu0 %v3448_v9  ;;  %v3880_v2 = vld [vmem:[#allocation20_spill] sm:$0xff] }
  0x9e   : > { %2380 = vmatpush3.bf16.msra.mxu1 %v3411_v16  ;;  %2103 = vmatprep.mubr.f32.mxu1 %v2881_v0  ;;  %v3874_v0 = vld [vmem:[#allocation8_spill] sm:$0xff]  ;;  %v3883_v16 = vld [vmem:[#allocation15_spill] sm:$0xff] }
  0x9f   : > { %2373 = vmatprep.subr.bf16.mxu1 %v3522_v42 }
  0xa0   : > { %1236 = vmatmul.mubr.f32.gmra.mrb[50].mxu0 %v3120_v53  ;;  %v3876_v53 = vld [vmem:[#allocation10_spill] sm:$0xff] }
  0xa1   : > { %2104 = vmatmul.mubr.f32.gmra.mrb[2].mxu1 %v3871_v62  ;;  %1240 = vmatprep.mubr.f32.mxu0 %v3463_v48 }
  0xa2   : > { %2381 = vmatpush3.bf16.msra.mxu1 %v3522_v42  ;;  %2106 = vmatprep.mubr.f32.mxu1 %v3872_v17 }
  0xa3   : > { %2374 = vmatprep.subr.bf16.mxu1 %v3537_v6 }
  0xa4   : > { %1241 = vmatmul.mubr.f32.gmra.mrb[52].mxu0 %v3177_v20  ;;  %v3877_v20 = vld [vmem:[#allocation11_spill] sm:$0xff] }
  0xa5   : > { %2107 = vmatmul.mubr.f32.gmra.mrb[4].mxu1 %v3873_v18  ;;  %1245 = vmatprep.mubr.f32.mxu0 %v3477_v49 }
  0xa6   : > { %2382 = vmatpush3.bf16.msra.mxu1 %v3537_v6  ;;  %2109 = vmatprep.mubr.f32.mxu1 %v3874_v0 }
  0xa7   : > { %2375 = vmatprep.subr.bf16.mxu1 %v3551_v25 }
  0xa8   : > { %1246 = vmatmul.mubr.f32.gmra.mrb[54].mxu0 %v3186_v29  ;;  %v3879_v29 = vld [vmem:[#allocation13_spill] sm:$0xff] }
  0xa9   : > { %2110 = vmatmul.mubr.f32.gmra.mrb[6].mxu1 %v3875_v46  ;;  %1250 = vmatprep.mubr.f32.mxu0 %v3492_v34 }
  0xaa   : > { %2383 = vmatpush3.bf16.msra.mxu1 %v3551_v25  ;;  %2112 = vmatprep.mubr.f32.mxu1 %v3876_v53 }
  0xab   : > { %2376 = vmatprep.subr.bf16.mxu1 %v3565_v59 }
  0xac   : > { %1251 = vmatmul.mubr.f32.gmra.mrb[56].mxu0 %v3249_v19  ;;  %v3882_v19 = vld [vmem:[#allocation18_spill] sm:$0xff] }
  0xad   : > { %2113 = vmatmul.mubr.f32.gmra.mrb[8].mxu1 %v3877_v20  ;;  %1255 = vmatprep.mubr.f32.mxu0 %v3506_v40 }
  0xae   : > { %2384 = vmatpush3.bf16.msra.mxu1 %v3565_v59  ;;  %2115 = vmatprep.mubr.f32.mxu1 %v3878_v60 }
  0xaf   : > { %2377 = vmatprep.subr.bf16.mxu1 %v2360_v43 }
  0xb0   : > { %1256 = vmatmul.mubr.f32.gmra.mrb[58].mxu0 %v3252_v26  ;;  %v3886_v26 = vld [vmem:[#allocation17_spill] sm:$0xff] }
  0xb1   : > { %2116 = vmatmul.mubr.f32.gmra.mrb[10].mxu1 %v3879_v29  ;;  %1260 = vmatprep.mubr.f32.mxu0 %v3880_v2 }
  0xb2   : > { %2385 = vmatpush3.bf16.msra.mxu1 %v2360_v43  ;;  %2118 = vmatprep.mubr.f32.mxu1 %v3881_v23 }
  0xb3   : > { %2378 = vmatprep.subr.bf16.mxu1 %v2364_v33 }
  0xb4   : > { %1261 = vmatmul.mubr.f32.gmra.mrb[60].mxu0 %v3882_v19 }
  0xb5   : > { %2119 = vmatmul.mubr.f32.gmra.mrb[12].mxu1 %v3883_v16  ;;  %1265 = vmatprep.mubr.f32.mxu0 %v3397_v4 }
  0xb6   : > { %2386 = vmatpush3.bf16.msra.mxu1 %v2364_v33  ;;  %2121 = vmatprep.mubr.f32.mxu1 %v3884_v10 }
  0xb7   : > { %2379 = vmatprep.subr.bf16.mxu1 %v2368_v54 }
  0xb8   : > { %1266 = vmatmul.mubr.f32.gmra.mrb[62].mxu0 %v3885_v35 }
  0xb9   : > { %2122 = vmatmul.mubr.f32.gmra.mrb[14].mxu1 %v3886_v26  ;;  %2156 = vmatprep.mubr.f32.mxu0 %v3872_v17 }
  0xba   : > { %2387 = vmatpush3.bf16.msra.mxu1 %v2368_v54  ;;  %2168 = vmatprep.mubr.f32.mxu1 %v3881_v23 }
  0xbc   : > { %2157 = vmatmul.mubr.f32.vlgmr.msra.gmra.mrb[64].mxu0 %v3873_v18 }
  0xbd   : > { %2169 = vmatmul.mubr.f32.vlgmr.msra.gmra.mrb[8].mxu1 %v3883_v16  ;;  %2159 = vmatprep.mubr.f32.mxu0 %v3874_v0 }
  0xbe   : > { %2171 = vmatprep.mubr.f32.mxu1 %v3884_v10 }
  0xc0   : > { %2160 = vmatmul.mubr.f32.gmra.mrb[66].mxu0 %v3875_v46 }
  0xc1   : > { %2172 = vmatmul.mubr.f32.gmra.mrb[10].mxu1 %v3886_v26  ;;  %2162 = vmatprep.mubr.f32.mxu0 %v3876_v53 }
  0xc2   : > { %2174 = vmatprep.mubr.f32.mxu1 %v3341_v7 }
  0xc4   : > { %2163 = vmatmul.mubr.f32.gmra.mrb[68].mxu0 %v3877_v20 }
  0xc5   : > { %2175 = vmatmul.mubr.f32.gmra.mrb[12].mxu1 %v3380_v3  ;;  %2165 = vmatprep.mubr.f32.mxu0 %v3878_v60 }
  0xc6   : > { %2177 = vmatprep.mubr.f32.mxu1 %v3392_v12 }
  0xc8   : > { %2166 = vmatmul.mubr.f32.gmra.mrb[70].mxu0 %v3879_v29 }
  0xc9   : > { %2178 = vmatmul.mubr.f32.gmra.mrb[14].mxu1 %v3400_v45 }
 0x10f   : > { %v1708_v4 = vpop.f32.mrb[0].mxu0 }
 0x110   : > { %v1709_v9 = vpop.f32.mrb[1].mxu0 }
 0x111   : > { %v1710_v52 = vadd.f32 %v1709_v9, %v1708_v4 }
 0x113   : > { %v1711_v24 = vpop.f32.mrb[2].mxu0 }
 0x114   : > { %v1712_v63 = vpop.f32.mrb[3].mxu0 }
 0x115   : > { %v1713_v48 = vadd.f32 %v1712_v63, %v1711_v24 }
 0x117   : > { %v1714_v1 = vpop.f32.mrb[4].mxu0 }
 0x118   : > { %v1715_v7 = vpop.f32.mrb[5].mxu0 }
 0x119   : > { %v1716_v27 = vadd.f32 %v1715_v7, %v1714_v1 }
 0x11b   : > { %v1717_v14 = vpop.f32.mrb[6].mxu0 }
 0x11c   : > { %v1718_v50 = vpop.f32.mrb[7].mxu0 }
 0x11d   : > { %v1719_v3 = vadd.f32 %v1718_v50, %v1717_v14 }
 0x11f   : > { %v1720_v49 = vpop.f32.mrb[8].mxu0 }
 0x120   : > { %v1721_v56 = vpop.f32.mrb[9].mxu0 }
 0x121   : > { %v1722_v15 = vadd.f32 %v1721_v56, %v1720_v49 }
 0x123   : > { %v1723_v12 = vpop.f32.mrb[10].mxu0 }
 0x124   : > { %v1724_v58 = vpop.f32.mrb[11].mxu0 }
 0x125   : > { %v1725_v51 = vadd.f32 %v1724_v58, %v1723_v12 }
 0x127   : > { %v1726_v30 = vpop.f32.mrb[12].mxu0 }
 0x128   : > { %v1727_v45 = vpop.f32.mrb[13].mxu0 }
 0x129   : > { %v1728_v34 = vadd.f32 %v1727_v45, %v1726_v30 }
 0x12b   : > { %v1729_v39 = vpop.f32.mrb[14].mxu0 }
 0x12c   : > { %v1730_v57 = vpop.f32.mrb[15].mxu0 }
 0x12d   : > { %v1731_v5 = vadd.f32 %v1730_v57, %v1729_v39 }
 0x12f   : > { %v1732_v31 = vpop.f32.mrb[16].mxu0 }
 0x130   : > { %v1820_v40 = vpop.f32.mrb[16].mxu1  ;;  %v1733_v8 = vpop.f32.mrb[17].mxu0 }
 0x131   : > { %v1734_v55 = vadd.f32 %v1733_v8, %v1732_v31  ;;  %v1821_v32 = vpop.f32.mrb[17].mxu1 }
 0x132   : > { %v1822_v42 = vadd.f32 %v1821_v32, %v1820_v40 }
 0x133   : > { %v1735_v11 = vpop.f32.mrb[18].mxu0 }
 0x134   : > { %v1823_v38 = vpop.f32.mrb[18].mxu1  ;;  %v1736_v6 = vpop.f32.mrb[19].mxu0  ;;  %v3663_v21 = vadd.f32 %v1822_v42, %v1710_v52 }
 0x135   : > { %v1737_v47 = vadd.f32 %v1736_v6, %v1735_v11  ;;  %v1824_v25 = vpop.f32.mrb[19].mxu1 }
 0x136   : > { %v1825_v22 = vadd.f32 %v1824_v25, %v1823_v38 }
 0x137   : > { %v1738_v41 = vpop.f32.mrb[20].mxu0 }
 0x138   : > { %v1826_v59 = vpop.f32.mrb[20].mxu1  ;;  %v1739_v36 = vpop.f32.mrb[21].mxu0  ;;  %v3665_v13 = vadd.f32 %v1825_v22, %v1713_v48 }
 0x139   : > { %v1740_v43 = vadd.f32 %v1739_v36, %v1738_v41  ;;  %v1827_v37 = vpop.f32.mrb[21].mxu1 }
 0x13a   : > { %v1828_v44 = vadd.f32 %v1827_v37, %v1826_v59 }
 0x13b   : > { %v1741_v33 = vpop.f32.mrb[22].mxu0 }
 0x13c   : > { %v1829_v61 = vpop.f32.mrb[22].mxu1  ;;  %v1742_v28 = vpop.f32.mrb[23].mxu0  ;;  %v3667_v54 = vadd.f32 %v1828_v44, %v1716_v27 }
 0x13d   : > { %v1743_v62 = vadd.f32 %v1742_v28, %v1741_v33  ;;  %v1830_v17 = vpop.f32.mrb[23].mxu1 }
 0x13e   : > { %v1831_v18 = vadd.f32 %v1830_v17, %v1829_v61 }
 0x13f   : > { %v1744_v0 = vpop.f32.mrb[24].mxu0 }
 0x140   : > { %v1832_v46 = vpop.f32.mrb[24].mxu1  ;;  %v1745_v53 = vpop.f32.mrb[25].mxu0  ;;  %v3669_v20 = vadd.f32 %v1831_v18, %v1719_v3 }
 0x141   : > { %v1746_v60 = vadd.f32 %v1745_v53, %v1744_v0  ;;  %v1833_v29 = vpop.f32.mrb[25].mxu1 }
 0x142   : > { %v1834_v2 = vadd.f32 %v1833_v29, %v1832_v46 }
 0x143   : > { %v1747_v23 = vpop.f32.mrb[26].mxu0 }
 0x144   : > { %v1835_v19 = vpop.f32.mrb[26].mxu1  ;;  %v1748_v16 = vpop.f32.mrb[27].mxu0  ;;  %v3671_v10 = vadd.f32 %v1834_v2, %v1722_v15 }
 0x145   : > { %v1749_v35 = vadd.f32 %v1748_v16, %v1747_v23  ;;  %v1836_v26 = vpop.f32.mrb[27].mxu1 }
 0x146   : > { %v1837_v4 = vadd.f32 %v1836_v26, %v1835_v19 }
 0x147   : > { %v1750_v9 = vpop.f32.mrb[28].mxu0 }
 0x148   : > { %v1838_v52 = vpop.f32.mrb[28].mxu1  ;;  %v1751_v24 = vpop.f32.mrb[29].mxu0  ;;  %v3673_v63 = vadd.f32 %v1837_v4, %v1725_v51 }
 0x149   : > { %v1752_v48 = vadd.f32 %v1751_v24, %v1750_v9  ;;  %v1839_v1 = vpop.f32.mrb[29].mxu1 }
 0x14a   : > { %v1840_v7 = vadd.f32 %v1839_v1, %v1838_v52 }
 0x14b   : > { %v1753_v27 = vpop.f32.mrb[30].mxu0 }
 0x14c   : > { %v1841_v14 = vpop.f32.mrb[30].mxu1  ;;  %v1754_v50 = vpop.f32.mrb[31].mxu0  ;;  %v3675_v3 = vadd.f32 %v1840_v7, %v1728_v34 }
 0x14d   : > { %v1755_v49 = vadd.f32 %v1754_v50, %v1753_v27  ;;  %v1842_v56 = vpop.f32.mrb[31].mxu1 }
 0x14e   : > { %v1843_v15 = vadd.f32 %v1842_v56, %v1841_v14 }
 0x14f   : > { %v1932_v12 = vpop.f32.mrb[32].mxu0 }
 0x150   : > { %v1844_v58 = vpop.f32.mrb[32].mxu1  ;;  %v1933_v30 = vpop.f32.mrb[33].mxu0  ;;  %v3677_v45 = vadd.f32 %v1843_v15, %v1731_v5 }
 0x151   : > { %v1845_v39 = vpop.f32.mrb[33].mxu1  ;;  %v3679_v57 = vadd.f32 %v1933_v30, %v1932_v12 }
 0x152   : > { %v1846_v51 = vadd.f32 %v1845_v39, %v1844_v58 }
 0x153   : > { %v1935_v31 = vpop.f32.mrb[34].mxu0 }
 0x154   : > { %v2423_v40 = vadd.f32 %v1846_v51, %v1734_v55  ;;  %v1847_v8 = vpop.f32.mrb[34].mxu1  ;;  %v1936_v32 = vpop.f32.mrb[35].mxu0 }
 0x155   : > { %v1848_v42 = vpop.f32.mrb[35].mxu1  ;;  %v1937_v11 = vadd.f32 %v1936_v32, %v1935_v31 }
 0x156   : > { %v1849_v34 = vadd.f32 %v1848_v42, %v1847_v8 }
 0x157   : > { %v1938_v38 = vpop.f32.mrb[36].mxu0 }
 0x158   : > { %v2420_v6 = vadd.f32 %v1849_v34, %v1737_v47  ;;  %v1850_v25 = vpop.f32.mrb[36].mxu1  ;;  %v1939_v22 = vpop.f32.mrb[37].mxu0 }
 0x159   : > { %v1851_v41 = vpop.f32.mrb[37].mxu1  ;;  %v1940_v59 = vadd.f32 %v1939_v22, %v1938_v38 }
 0x15a   : > { %v1852_v36 = vadd.f32 %v1851_v41, %v1850_v25 }
 0x15b   : > { %v1941_v5 = vpop.f32.mrb[38].mxu0 }
 0x15c   : > { %v3681_v37 = vadd.f32 %v1852_v36, %v1740_v43  ;;  %v1853_v44 = vpop.f32.mrb[38].mxu1  ;;  %v1942_v33 = vpop.f32.mrb[39].mxu0 }
 0x15d   : > { %v1854_v61 = vpop.f32.mrb[39].mxu1  ;;  %v1943_v28 = vadd.f32 %v1942_v33, %v1941_v5 }
 0x15e   : > { %v1855_v55 = vadd.f32 %v1854_v61, %v1853_v44 }
 0x15f   : > { %v1944_v17 = vpop.f32.mrb[40].mxu0 }
 0x160   : > { %v3683_v18 = vadd.f32 %v1855_v55, %v1743_v62  ;;  %v1856_v0 = vpop.f32.mrb[40].mxu1  ;;  %v1945_v46 = vpop.f32.mrb[41].mxu0 }
 0x161   : > { %v1857_v53 = vpop.f32.mrb[41].mxu1  ;;  %v1946_v47 = vadd.f32 %v1945_v46, %v1944_v17 }
 0x162   : > { %v1858_v29 = vadd.f32 %v1857_v53, %v1856_v0 }
 0x163   : > { %v1947_v2 = vpop.f32.mrb[42].mxu0 }
 0x164   : > { %v3685_v23 = vadd.f32 %v1858_v29, %v1746_v60  ;;  %v1859_v19 = vpop.f32.mrb[42].mxu1  ;;  %v1948_v16 = vpop.f32.mrb[43].mxu0 }
 0x165   : > { %v1860_v43 = vpop.f32.mrb[43].mxu1  ;;  %v1949_v26 = vadd.f32 %v1948_v16, %v1947_v2 }
 0x166   : > { %v1861_v4 = vadd.f32 %v1860_v43, %v1859_v19 }
 0x167   : > { %v1950_v9 = vpop.f32.mrb[44].mxu0 }
 0x168   : > { %v2432_v52 = vadd.f32 %v1861_v4, %v1749_v35  ;;  %v1862_v24 = vpop.f32.mrb[44].mxu1  ;;  %v1951_v1 = vpop.f32.mrb[45].mxu0 }
 0x169   : > { %v1863_v7 = vpop.f32.mrb[45].mxu1  ;;  %v1952_v62 = vadd.f32 %v1951_v1, %v1950_v9 }
 0x16a   : > { %v1864_v27 = vadd.f32 %v1863_v7, %v1862_v24 }
 0x16b   : > { %v1953_v14 = vpop.f32.mrb[46].mxu0 }
 0x16c   : > { %v2441_v50 = vadd.f32 %v1864_v27, %v1752_v48  ;;  %v1865_v56 = vpop.f32.mrb[46].mxu1  ;;  %v1954_v15 = vpop.f32.mrb[47].mxu0 }
 0x16d   : > { %v1866_v12 = vpop.f32.mrb[47].mxu1  ;;  %v1955_v58 = vadd.f32 %v1954_v15, %v1953_v14  ;;  %v3715_v15 = vld [vmem:[%s3822_s2] ss:$0 sm:$0xff] }
 0x16e   : > { %v1867_v60 = vadd.f32 %v1866_v12, %v1865_v56 }
 0x16f   : > { %v1956_v30 = vpop.f32.mrb[48].mxu0 }
 0x170   : > { %v2438_v39 = vadd.f32 %v1867_v60, %v1755_v49  ;;  %v2102_v51 = vpop.f32.mrb[0].mxu1  ;;  %v1957_v31 = vpop.f32.mrb[49].mxu0 }
 0x171   : > { %v2389_v8 = vadd.f32 %v3665_v13, %v2102_v51  ;;  %v998_v32 = vpop.f32.mrb[1].mxu1  ;;  %v1958_v35 = vadd.f32 %v1957_v31, %v1956_v30 }
 0x172   : > { %v2393_v42 = vadd.f32 %v3663_v21, %v998_v32 }
 0x173   : > { %v1959_v34 = vpop.f32.mrb[50].mxu0  ;;  %v2390_v38 = vadd.f32 %v2389_v8, %v1937_v11  ;;  %v2424_v25 = vadd.f32 %v2423_v40, %v1958_v35 }
 0x174   : > { %v2105_v22 = vpop.f32.mrb[2].mxu1  ;;  %v1960_v48 = vpop.f32.mrb[51].mxu0  ;;  %v2394_v41 = vadd.f32 %v2393_v42, %v3679_v57 }
 0x175   : > { %v2397_v36 = vadd.f32 %v3669_v20, %v2105_v22  ;;  %v1008_v5 = vpop.f32.mrb[3].mxu1  ;;  %v1961_v44 = vadd.f32 %v1960_v48, %v1959_v34 }
 0x176   : > { %v2401_v49 = vadd.f32 %v3667_v54, %v1008_v5 }
 0x177   : > { %v1962_v33 = vpop.f32.mrb[52].mxu0  ;;  %v2421_v61 = vadd.f32 %v2420_v6, %v1961_v44  ;;  %v2398_v13 = vadd.f32 %v2397_v36, %v1943_v28 }
 0x178   : > { %v2108_v55 = vpop.f32.mrb[4].mxu1  ;;  %v1963_v17 = vpop.f32.mrb[53].mxu0  ;;  %v2402_v0 = vadd.f32 %v2401_v49, %v1940_v59 }
 0x179   : > { %v2405_v21 = vadd.f32 %v3673_v63, %v2108_v55  ;;  %v1018_v11 = vpop.f32.mrb[5].mxu1  ;;  %v1964_v40 = vadd.f32 %v1963_v17, %v1962_v33 }
 0x17a   : > { %v2409_v46 = vadd.f32 %v3671_v10, %v1018_v11 }
 0x17b   : > { %v1965_v53 = vpop.f32.mrb[54].mxu0  ;;  %v2430_v57 = vadd.f32 %v3681_v37, %v1964_v40  ;;  %v3695_v20 = vadd.f32 %v2405_v21, %v1949_v26 }
 0x17c   : > { %v2111_v29 = vpop.f32.mrb[6].mxu1  ;;  %v1966_v2 = vpop.f32.mrb[55].mxu0  ;;  %v3697_v54 = vadd.f32 %v2409_v46, %v1946_v47 }
 0x17d   : > { %v2413_v6 = vadd.f32 %v3677_v45, %v2111_v29  ;;  %v1028_v28 = vpop.f32.mrb[7].mxu1  ;;  %v1967_v19 = vadd.f32 %v1966_v2, %v1965_v53 }
 0x17e   : > { %v2417_v59 = vadd.f32 %v3675_v3, %v1028_v28 }
 0x17f   : > { %v1968_v63 = vpop.f32.mrb[56].mxu0  ;;  %v2427_v16 = vadd.f32 %v3683_v18, %v1967_v19  ;;  %v3702_v10 = vadd.f32 %v2413_v6, %v1955_v58 }
 0x180   : > { %v1969_v43 = vpop.f32.mrb[57].mxu0  ;;  %v3704_v37 = vadd.f32 %v2417_v59, %v1952_v62 }
 0x181   : > { %v1970_v26 = vadd.f32 %v1969_v43, %v1968_v63 }
 0x183   : > { %v1971_v4 = vpop.f32.mrb[58].mxu0  ;;  %v2436_v47 = vadd.f32 %v3685_v23, %v1970_v26 }
 0x184   : > { %v1972_v9 = vpop.f32.mrb[59].mxu0 }
 0x185   : > { %v1973_v45 = vadd.f32 %v1972_v9, %v1971_v4 }
 0x187   : > { %v1974_v24 = vpop.f32.mrb[60].mxu0  ;;  %v2433_v1 = vadd.f32 %v2432_v52, %v1973_v45 }
 0x188   : > { %v1975_v7 = vpop.f32.mrb[61].mxu0 }
 0x189   : > { %v1976_v3 = vadd.f32 %v1975_v7, %v1974_v24 }
 0x18b   : > { %v1977_v27 = vpop.f32.mrb[62].mxu0  ;;  %v3708_v14 = vadd.f32 %v2441_v50, %v1976_v3 }
 0x18c   : > { %v1978_v18 = vpop.f32.mrb[63].mxu0 }
 0x18d   : > { %v1979_v56 = vadd.f32 %v1978_v18, %v1977_v27 }
 0x18f   : > { %v2158_v62 = vpop.f32.mrb[64].mxu0  ;;  %v2439_v23 = vadd.f32 %v2438_v39, %v1979_v56 }
 0x190   : > { %v2391_v12 = vadd.f32 %v2390_v38, %v2158_v62  ;;  %v2170_v58 = vpop.f32.mrb[8].mxu1  ;;  %v1337_v52 = vpop.f32.mrb[65].mxu0 }
 0x191   : > { %v2422_v60 = vadd.f32 %v2421_v61, %v2170_v58  ;;  %v2395_v30 = vadd.f32 %v2394_v41, %v1337_v52  ;;  %v1377_v51 = vpop.f32.mrb[9].mxu1 }
 0x192   : > { %v1440_v50 = vadd.f32 %v2391_v12, %v3715_v15  ;;  %v2425_v31 = vadd.f32 %v2424_v25, %v1377_v51 }
 0x193   : > { %v1448_v8 = vadd.f32 %v2422_v60, %v3715_v15  ;;  %v1439_v32 = vadd.f32 %v2395_v30, %v3715_v15  ;;  %v2161_v35 = vpop.f32.mrb[66].mxu0 }
 0x194   : > { %1456 = vst [vmem:[%s3720_s29 + $0x8] sm:$0xff] %v1440_v50  ;;  %v1447_v39 = vadd.f32 %v2425_v31, %v3715_v15  ;;  %v2399_v42 = vadd.f32 %v2398_v13, %v2161_v35  ;;  %v2173_v34 = vpop.f32.mrb[10].mxu1  ;;  %v1347_v38 = vpop.f32.mrb[67].mxu0 }
 0x195   : > { %1464 = vst [vmem:[%s3720_s29 + $0x48] sm:$0xff] %v1448_v8  ;;  %1455 = vst [vmem:[%s3720_s29] sm:$0xff] %v1439_v32  ;;  %v2428_v25 = vadd.f32 %v2427_v16, %v2173_v34  ;;  %v2403_v22 = vadd.f32 %v2402_v0, %v1347_v38  ;;  %v1387_v48 = vpop.f32.mrb[11].mxu1 }
 0x196   : > { %1463 = vst [vmem:[%s3720_s29 + $0x40] sm:$0xff] %v1447_v39  ;;  %v1442_v41 = vadd.f32 %v2399_v42, %v3715_v15  ;;  %v2431_v36 = vadd.f32 %v2430_v57, %v1387_v48 }
 0x197   : > { %v1450_v5 = vadd.f32 %v2428_v25, %v3715_v15  ;;  %v1441_v44 = vadd.f32 %v2403_v22, %v3715_v15  ;;  %v2164_v49 = vpop.f32.mrb[68].mxu0 }
 0x198   : > { %1458 = vst [vmem:[%s3720_s29 + $0x18] sm:$0xff] %v1442_v41  ;;  %v1449_v33 = vadd.f32 %v2431_v36, %v3715_v15  ;;  %v2407_v61 = vadd.f32 %v3695_v20, %v2164_v49  ;;  %v2176_v13 = vpop.f32.mrb[12].mxu1  ;;  %v1357_v55 = vpop.f32.mrb[69].mxu0 }
 0x199   : > { %1466 = vst [vmem:[%s3720_s29 + $0x58] sm:$0xff] %v1450_v5  ;;  %1457 = vst [vmem:[%s3720_s29 + $0x10] sm:$0xff] %v1441_v44  ;;  %v2434_v17 = vadd.f32 %v2433_v1, %v2176_v13  ;;  %v2411_v0 = vadd.f32 %v3697_v54, %v1357_v55  ;;  %v1397_v21 = vpop.f32.mrb[13].mxu1 }
 0x19a   : > { %1465 = vst [vmem:[%s3720_s29 + $0x50] sm:$0xff] %v1449_v33  ;;  %v1444_v11 = vadd.f32 %v2407_v61, %v3715_v15  ;;  %v2437_v40 = vadd.f32 %v2436_v47, %v1397_v21 }
 0x19b   : > { %v1452_v46 = vadd.f32 %v2434_v17, %v3715_v15  ;;  %v1443_v53 = vadd.f32 %v2411_v0, %v3715_v15  ;;  %v2167_v57 = vpop.f32.mrb[70].mxu0 }
 0x19c   : > { %1460 = vst [vmem:[%s3720_s29 + $0x28] sm:$0xff] %v1444_v11  ;;  %v1451_v20 = vadd.f32 %v2437_v40, %v3715_v15  ;;  %v2415_v29 = vadd.f32 %v3702_v10, %v2167_v57  ;;  %v2179_v2 = vpop.f32.mrb[14].mxu1  ;;  %v1367_v54 = vpop.f32.mrb[71].mxu0 }
 0x19d   : > { %1468 = vst [vmem:[%s3720_s29 + $0x68] sm:$0xff] %v1452_v46  ;;  %1459 = vst [vmem:[%s3720_s29 + $0x20] sm:$0xff] %v1443_v53  ;;  %v2440_v6 = vadd.f32 %v2439_v23, %v2179_v2  ;;  %v2419_v28 = vadd.f32 %v3704_v37, %v1367_v54  ;;  %v1407_v19 = vpop.f32.mrb[15].mxu1 }
 0x19e   : > { %1467 = vst [vmem:[%s3720_s29 + $0x60] sm:$0xff] %v1451_v20  ;;  %v1446_v59 = vadd.f32 %v2415_v29, %v3715_v15  ;;  %v2443_v63 = vadd.f32 %v3708_v14, %v1407_v19 }
 0x19f   : > { %v1454_v16 = vadd.f32 %v2440_v6, %v3715_v15  ;;  %v1445_v10 = vadd.f32 %v2419_v28, %v3715_v15 }
 0x1a0   : > { %1462 = vst [vmem:[%s3720_s29 + $0x38] sm:$0xff] %v1446_v59  ;;  %v1453_v43 = vadd.f32 %v2443_v63, %v3715_v15 }
 0x1a1   : > { %1470 = vst [vmem:[%s3720_s29 + $0x78] sm:$0xff] %v1454_v16  ;;  %1461 = vst [vmem:[%s3720_s29 + $0x30] sm:$0xff] %v1445_v10 }
 0x1a2   : > { %1469 = vst [vmem:[%s3720_s29 + $0x70] sm:$0xff] %v1453_v43 }
 0x1a3   : > { %2555 = shalt.err (!%p2552_p6)
}
 0x1a4   : > { %s2556_s5 = scalar_lea.hbm %s3757_s21, 2048  ;;  %s2560_s11 = scalar_lea.hbm %s3823_s3, 8192 }
 0x1a5   : > { %p2557_p7 = scmp.ne.s32.totalorder %s3757_s21, %s2556_s5  ;;  %p2561_p11 = scmp.lt.u32.totalorder %s3757_s21, %s3823_s3 }
 0x1a6   : > { %p2562_p12 = scmp.lt.u32.totalorder %s2560_s11, %s2556_s5  ;;  %p2564_p0 = scmp.lt.u32.totalorder %s2556_s5, %s3757_s21 }
 0x1a7   : > { %p2558_p9 = pnand %p2557_p7, %p2712_p3 }
 0x1a8   : > { %p2563_p13 = por %p2562_p12, %p2561_p11 }
 0x1a9   : > { %p2559_p10 = pneg %p2558_p9 }
 0x1aa   : > { %p2565_p1 = por %p2564_p0, %p2563_p13 }
 0x1ac   : > { %p2566_p2 = pnand %p2565_p1, %p2559_p10 }
 0x1ae   : > { %2569 = shalt.err (!%p2566_p2)
}
 0x1af   : > { %s2639_s16 = smov 128   ;;  %s2640_s7 = smov 8  }
 0x1b0   : > { %2469 = dma.vmem_to_hbm [thread:$0]  (%p2712_p3), %s3759_s20, 2048, %s3757_s21, %s3768_s27, %s2639_s16, %s2639_s16, %s2640_s7  }
 0x1b1 PF: > { %p2475_p4 = scmp.ge.s32.totalorder %s2636_s19, 2  ;;  %s1502_s10 = sand.u32 1, %s2608_s12  }
 0x1b2   : > { %s1503_s28 = scalar_lea.sflag [#allocation3], %s1502_s10 }
 0x1b3   : > { %p2472_p5 = pnand %p2475_p4, %p2721_p8 }
 0x1b5   : > { %2603 = dma.done.wait (!%p2472_p5), %s1503_s28, 2048  }
 0x1b6   : > { %2605 = vsyncadd (!%p2472_p5), %s1503_s28, 4294965248  ;;  %s16_s19 = sadd.s32 1, %s2636_s19   ;;  %s3887_s12 = smov %s2612_s13 }
 0x1b7   : > { %p13_p6 = scmp.ge.s32.totalorder %s16_s19, 6   ;;  %s3888_s13 = smov %s2616_s14 }
 0x1b8   : > { %s3889_s14 = smov %s2730_s30  ;;  %s3890_s15 = smov %s2628_s17 }
 0x1b9   : > { %s3891_s16 = smov %s2632_s18  ;;  %s3892_s17 = smov %s3895_s22 }
 0x1ba   : > { %s3893_s18 = smov %s3899_s23  ;;  %15 = sbr.rel (!%p13_p6) target bundleno = 5 (0x5), region = 69 }
 0x1c1   :  { %1508 = vsyncpa [#allocation3], 1 }
 0x1c2   :  { %1510 = vsyncpa [#allocation3 + $0x1], 1 }

</bundles_post_ra>
